<compile_context>
chip_gen: v5e
topology: v5e:2x2
jax: 0.10.0
libtpu: 0.0.40
codegen_flags: <defaults>
</compile_context>

<pallas_src>
import functools

import jax
import jax.numpy as jnp
from jax.experimental import pallas as pl
from jax.experimental.pallas import tpu as pltpu  # noqa: F401  (TPU backend assumed)

NUM_LAYERS = 2
IN_FEATURES = 4


def _rnn_reward_kernel(traj_ref, state0_ref, w_ref, misc_ref,
                       reward_ref, staten_ref):
    # traj_ref : [S*Bp, 4]  bf16, time-major, batch padded to Bp (multiple of 8)
    # state0_ref/staten_ref : [4, Bp, H] f32  rows = (h1, h2, c1, c2)
    # w_ref    : [4H, 4H] bf16  rows = (W_ih1ᵀ, W_hh1ᵀ, W_ih2ᵀ, W_hh2ᵀ)
    # misc_ref : [8, 4H]  f32   rows = (W_inᵀ[4], b_in, b1, b2, [w_head|b_head])
    _, Bp, H = state0_ref.shape
    S = traj_ref.shape[0] // Bp
    H4 = 4 * H

    # ---- Unpack slabs with static slices (one shot, off the critical path) --
    misc = misc_ref[...]
    w_in = misc[0:4, 0:H].astype(jnp.bfloat16)        # [4, H]
    b_in = misc[4:5, 0:H]                              # [1, H]
    b1 = misc[5:6, :]                                  # [1, 4H] (= b_ih1 + b_hh1)
    b2 = misc[6:7, :]                                  # [1, 4H] (= b_ih2 + b_hh2)
    w_head = misc[7:8, 0:H]                            # [1, H]
    b_head = misc[7:8, H:H + 1]                        # [1, 1]

    w = w_ref[...]                                     # [4H, 4H] bf16
    w_ih1 = w[0 * H:1 * H]
    w_hh1 = w[1 * H:2 * H]
    w_ih2 = w[2 * H:3 * H]
    w_hh2 = w[3 * H:4 * H]

    # ---- Precompute (large MXU-friendly matmuls, off the recurrence path) --
    # x_p = relu(traj @ W_in + b_in)                    -> [S*Bp, H]
    x_p = jnp.maximum(
        jnp.dot(traj_ref[...], w_in, preferred_element_type=jnp.float32)
        + b_in, 0.0)
    # TODO(synk): nn.Dropout(0.1) and the LSTM inter-layer dropout are identity
    # in eval mode; training-mode dropout would need pltpu.prng_* masking.

    # Layer-1 input->hidden gate contribution for all timesteps, bias folded.
    gates1_all = (jnp.dot(x_p.astype(jnp.bfloat16), w_ih1,
                          preferred_element_type=jnp.float32)
                  + b1)                                 # [S*Bp, 4H]

    b2b = jnp.broadcast_to(b2, (Bp, H4))                # hoisted broadcast

    def cell(gates, c):
        """PyTorch LSTM cell update from pre-activation gates (i,f,g,o)."""
        sig = jax.nn.sigmoid(gates)                     # one EUP pass / vreg
        i = sig[:, 0 * H:1 * H]
        f = sig[:, 1 * H:2 * H]
        o = sig[:, 3 * H:4 * H]
        g = jnp.tanh(gates[:, 2 * H:3 * H])
        c_new = f * c + i * g
        h_new = o * jnp.tanh(c_new)
        return h_new, c_new

    h1, h2 = state0_ref[0], state0_ref[1]
    c1, c2 = state0_ref[2], state0_ref[3]

    # ---- Recurrence: fully unrolled (S is a small compile-time constant). ---
    for t in range(S):
        # Layer 1: only the hidden->hidden matmul is on the critical path.
        g1 = gates1_all[t * Bp:(t + 1) * Bp, :] + jnp.dot(
            h1.astype(jnp.bfloat16), w_hh1, preferred_element_type=jnp.float32)
        h1, c1 = cell(g1, c1)
        # Layer 2: two dots (no lane concat on the critical path).
        g2 = (jnp.dot(h1.astype(jnp.bfloat16), w_ih2,
                      preferred_element_type=jnp.float32)
              + jnp.dot(h2.astype(jnp.bfloat16), w_hh2,
                        preferred_element_type=jnp.float32)
              + b2b)
        h2, c2 = cell(g2, c2)

    # ---- Reward head: VPU multiply + lane reduction (no 1-wide MXU op). ----
    reward_ref[...] = (jnp.sum(h2 * w_head, axis=-1, keepdims=True) + b_head)

    staten_ref[0] = h1
    staten_ref[1] = h2
    staten_ref[2] = c1
    staten_ref[3] = c2


def init_params(key, hidden_size=32):
    """Deterministic parameters, PyTorch-style uniform(-1/sqrt(fan), 1/sqrt(fan)).

    Stored in PyTorch layout: Linear/LSTM weights are [out_features, in_features].
    """
    H = hidden_size
    ks = jax.random.split(key, 14)

    def u(k, shape, fan_in):
        bound = 1.0 / float(fan_in) ** 0.5
        return jax.random.uniform(k, shape, jnp.float32, -bound, bound)

    return dict(
        w_in=u(ks[0], (H, IN_FEATURES), IN_FEATURES),      # input_projection.weight
        b_in=u(ks[1], (1, H), IN_FEATURES),                # input_projection.bias
        w_ih1=u(ks[2], (4 * H, H), H),                     # rnn.weight_ih_l0
        w_hh1=u(ks[3], (4 * H, H), H),                     # rnn.weight_hh_l0
        b_ih1=u(ks[4], (1, 4 * H), H),                     # rnn.bias_ih_l0
        b_hh1=u(ks[5], (1, 4 * H), H),                     # rnn.bias_hh_l0
        w_ih2=u(ks[6], (4 * H, H), H),                     # rnn.weight_ih_l1
        w_hh2=u(ks[7], (4 * H, H), H),                     # rnn.weight_hh_l1
        b_ih2=u(ks[8], (1, 4 * H), H),                     # rnn.bias_ih_l1
        b_hh2=u(ks[9], (1, 4 * H), H),                     # rnn.bias_hh_l1
        w_head=u(ks[10], (1, H), H),                       # reward_head.weight
        b_head=u(ks[11], (1, 1), H),                       # reward_head.bias
    )


@functools.partial(jax.jit, static_argnames=("hidden_size",))
def rnn_reward_forward(trajectory_features, params, hidden_state=None,
                       hidden_size=32):
    """Equivalent of RNNRewardModel.forward (eval mode).

    Args:
      trajectory_features: [B, S, 4] float32 (PyTorch batch-first layout).
      params: dict from init_params.
      hidden_state: optional (h0, c0), each [2, B, H].
    Returns:
      (reward [B], (h_n [2, B, H], c_n [2, B, H]))
    """
    B, S, F = trajectory_features.shape
    assert F == IN_FEATURES
    H = hidden_size
    H4 = 4 * H
    Bp = ((B + 7) // 8) * 8                    # pad batch to the 8-sublane tile

    # --- Glue (tiny, outside the kernel): time-major + batch pad + slabs. ---
    traj_tm = jnp.transpose(trajectory_features.astype(jnp.float32),
                            (1, 0, 2))                        # [S, B, 4]
    traj_tm = jnp.pad(traj_tm, ((0, 0), (0, Bp - B), (0, 0)))  # [S, Bp, 4]
    traj_tm = traj_tm.reshape(S * Bp, F).astype(jnp.bfloat16)  # [S*Bp, 4] bf16

    if hidden_state is None:
        h0 = jnp.zeros((NUM_LAYERS, B, H), jnp.float32)
        c0 = jnp.zeros((NUM_LAYERS, B, H), jnp.float32)
    else:
        h0, c0 = hidden_state
    state0 = jnp.concatenate([h0.astype(jnp.float32),
                              c0.astype(jnp.float32)], axis=0)   # [4, B, H]
    state0 = jnp.pad(state0, ((0, 0), (0, Bp - B), (0, 0)))      # [4, Bp, H]

    # Weight slab [4H, 4H] bf16: (W_ih1ᵀ; W_hh1ᵀ; W_ih2ᵀ; W_hh2ᵀ).
    w_slab = jnp.concatenate(
        [params["w_ih1"].T, params["w_hh1"].T,
         params["w_ih2"].T, params["w_hh2"].T], axis=0).astype(jnp.bfloat16)

    # Misc slab [8, 4H] f32: W_inᵀ (4 rows), b_in, b1, b2, [w_head | b_head].
    def padcols(a):
        return jnp.pad(a, ((0, 0), (0, H4 - a.shape[1])))
    b1 = params["b_ih1"] + params["b_hh1"]
    b2 = params["b_ih2"] + params["b_hh2"]
    head_row = jnp.concatenate([params["w_head"], params["b_head"]], axis=1)
    misc = jnp.concatenate([
        padcols(params["w_in"].T),        # rows 0..3
        padcols(params["b_in"]),          # row 4
        b1,                               # row 5
        b2,                               # row 6
        padcols(head_row),                # row 7
    ], axis=0).astype(jnp.float32)        # [8, 4H]

    out_shapes = (
        jax.ShapeDtypeStruct((Bp, 1), jnp.float32),        # reward (pre-squeeze)
        jax.ShapeDtypeStruct((4, Bp, H), jnp.float32),     # (h1,h2,c1,c2)
    )

    reward, state_n = pl.pallas_call(
        _rnn_reward_kernel,
        out_shape=out_shapes,
        # Zero-copy state carry: padded state slab is a fresh jit intermediate,
        # so this alias is genuinely in-place.
        input_output_aliases={1: 1},
    )(traj_tm, state0, w_slab, misc)

    h_n = state_n[0:2, :B, :]
    c_n = state_n[2:4, :B, :]
    return reward[:B, 0], (h_n, c_n)


def _reference_forward(traj, params, hidden_size):
    """Pure-JAX f32 reference matching PyTorch eval-mode semantics."""
    B, S, _ = traj.shape
    H = hidden_size
    x = jnp.maximum(traj @ params["w_in"].T + params["b_in"], 0.0)   # [B,S,H]

    def cell(x_t, h, c, w_ih, w_hh, b_ih, b_hh):
        gates = x_t @ w_ih.T + h @ w_hh.T + b_ih + b_hh
        i, f, g, o = jnp.split(gates, 4, axis=-1)
        i, f, o = jax.nn.sigmoid(i), jax.nn.sigmoid(f), jax.nn.sigmoid(o)
        g = jnp.tanh(g)
        c = f * c + i * g
        h = o * jnp.tanh(c)
        return h, c

    h1 = jnp.zeros((B, H), jnp.float32)
    c1 = jnp.zeros((B, H), jnp.float32)
    h2 = jnp.zeros((B, H), jnp.float32)
    c2 = jnp.zeros((B, H), jnp.float32)
    for t in range(S):
        h1, c1 = cell(x[:, t], h1, c1, params["w_ih1"], params["w_hh1"],
                      params["b_ih1"], params["b_hh1"])
        h2, c2 = cell(h1, h2, c2, params["w_ih2"], params["w_hh2"],
                      params["b_ih2"], params["b_hh2"])
    reward = (h2 @ params["w_head"].T + params["b_head"])[:, 0]
    return reward, jnp.stack([h1, h2]), jnp.stack([c1, c2])


if __name__ == "__main__":
    key = jax.random.PRNGKey(0)
    pkey, xkey = jax.random.split(key)

    B, S, H = 2, 8, 32
    params = init_params(pkey, hidden_size=H)
    trajectory_features = jax.random.normal(xkey, (B, S, IN_FEATURES), jnp.float32)

    reward, (h_n, c_n) = rnn_reward_forward(trajectory_features, params,
                                            hidden_size=H)
    jax.block_until_ready((reward, h_n, c_n))

    assert reward.shape == (B,)
    assert h_n.shape == (NUM_LAYERS, B, H)
    assert c_n.shape == (NUM_LAYERS, B, H)
    assert bool(jnp.all(jnp.isfinite(reward)))

    # Correctness check vs pure-JAX f32 reference of the PyTorch module.
    # Tolerance loosened to 2e-2 because the kernel uses bf16 MXU operands
    # (f32 accumulation) through an 8-step recurrence.
    r_ref, h_ref, c_ref = _reference_forward(trajectory_features, params, H)
    assert bool(jnp.allclose(reward, r_ref, atol=2e-2, rtol=2e-2))
    assert bool(jnp.allclose(h_n, h_ref, atol=2e-2, rtol=2e-2))
    assert bool(jnp.allclose(c_n, c_ref, atol=2e-2, rtol=2e-2))

    print("KERNEL_OK")
</pallas_src>

<mosaic_0001>
module attributes {stable_mosaic.version = 11 : i64} {
  func.func @_rnn_reward_kernel(%arg0: memref<64x4xbf16, #tpu.memory_space<vmem>>, %arg1: memref<4x8x32xf32, #tpu.memory_space<vmem>>, %arg2: memref<128x128xbf16, #tpu.memory_space<vmem>>, %arg3: memref<8x128xf32, #tpu.memory_space<vmem>>, %arg4: memref<8x1xf32, #tpu.memory_space<vmem>>, %arg5: memref<4x8x32xf32, #tpu.memory_space<vmem>>) attributes {dimension_semantics = [], scalar_prefetch = 0 : i64, scratch_operands = 0 : i64, tpu.core_type = #tpu.core_type<tc>} {
    %c0 = arith.constant 0 : index
    %c0_0 = arith.constant 0 : index
    %0 = vector.load %arg3[%c0, %c0_0] : memref<8x128xf32, #tpu.memory_space<vmem>>, vector<8x128xf32>
    %1 = vector.extract_strided_slice %0 {offsets = [0, 0], sizes = [4, 32], strides = [1, 1]} : vector<8x128xf32> to vector<4x32xf32>
    %2 = arith.truncf %1 : vector<4x32xf32> to vector<4x32xbf16>
    %3 = vector.extract_strided_slice %0 {offsets = [4, 0], sizes = [1, 32], strides = [1, 1]} : vector<8x128xf32> to vector<1x32xf32>
    %4 = vector.extract_strided_slice %0 {offsets = [5, 0], sizes = [1, 128], strides = [1, 1]} : vector<8x128xf32> to vector<1x128xf32>
    %5 = vector.extract_strided_slice %0 {offsets = [6, 0], sizes = [1, 128], strides = [1, 1]} : vector<8x128xf32> to vector<1x128xf32>
    %6 = vector.extract_strided_slice %0 {offsets = [7, 0], sizes = [1, 32], strides = [1, 1]} : vector<8x128xf32> to vector<1x32xf32>
    %7 = vector.extract_strided_slice %0 {offsets = [7, 32], sizes = [1, 1], strides = [1, 1]} : vector<8x128xf32> to vector<1x1xf32>
    %c0_1 = arith.constant 0 : index
    %c0_2 = arith.constant 0 : index
    %8 = vector.load %arg2[%c0_1, %c0_2] : memref<128x128xbf16, #tpu.memory_space<vmem>>, vector<128x128xbf16>
    %9 = vector.extract_strided_slice %8 {offsets = [0, 0], sizes = [32, 128], strides = [1, 1]} : vector<128x128xbf16> to vector<32x128xbf16>
    %10 = vector.extract_strided_slice %8 {offsets = [32, 0], sizes = [32, 128], strides = [1, 1]} : vector<128x128xbf16> to vector<32x128xbf16>
    %11 = vector.extract_strided_slice %8 {offsets = [64, 0], sizes = [32, 128], strides = [1, 1]} : vector<128x128xbf16> to vector<32x128xbf16>
    %12 = vector.extract_strided_slice %8 {offsets = [96, 0], sizes = [32, 128], strides = [1, 1]} : vector<128x128xbf16> to vector<32x128xbf16>
    %c0_3 = arith.constant 0 : index
    %c0_4 = arith.constant 0 : index
    %13 = vector.load %arg0[%c0_3, %c0_4] : memref<64x4xbf16, #tpu.memory_space<vmem>>, vector<64x4xbf16>
    %cst = arith.constant dense<0.000000e+00> : vector<64x32xf32>
    %14 = tpu.matmul %13, %2, %cst {dimension_numbers = #tpu.dot_dimension_numbers<[1], [0], [0], [1], [0, 0, 1, 1], [], []>} : vector<64x4xbf16>, vector<4x32xbf16>, vector<64x32xf32> -> vector<64x32xf32>
    %15 = vector.broadcast %3 : vector<1x32xf32> to vector<64x32xf32>
    %16 = arith.addf %14, %15 : vector<64x32xf32>
    %cst_5 = arith.constant 0.000000e+00 : f32
    %17 = vector.broadcast %cst_5 : f32 to vector<64x32xf32>
    %18 = arith.maximumf %16, %17 : vector<64x32xf32>
    %19 = arith.truncf %18 : vector<64x32xf32> to vector<64x32xbf16>
    %cst_6 = arith.constant dense<0.000000e+00> : vector<64x128xf32>
    %20 = tpu.matmul %19, %9, %cst_6 {dimension_numbers = #tpu.dot_dimension_numbers<[1], [0], [0], [1], [0, 0, 1, 1], [], []>} : vector<64x32xbf16>, vector<32x128xbf16>, vector<64x128xf32> -> vector<64x128xf32>
    %21 = vector.broadcast %4 : vector<1x128xf32> to vector<64x128xf32>
    %22 = arith.addf %20, %21 : vector<64x128xf32>
    %23 = vector.shape_cast %5 : vector<1x128xf32> to vector<1x128xf32>
    %24 = vector.broadcast %23 : vector<1x128xf32> to vector<8x128xf32>
    %c0_7 = arith.constant 0 : index
    %c0_8 = arith.constant 0 : index
    %c0_9 = arith.constant 0 : index
    %25 = vector.load %arg1[%c0_7, %c0_8, %c0_9] : memref<4x8x32xf32, #tpu.memory_space<vmem>>, vector<1x8x32xf32>
    %26 = vector.shape_cast %25 : vector<1x8x32xf32> to vector<8x32xf32>
    %c1 = arith.constant 1 : index
    %c0_10 = arith.constant 0 : index
    %c0_11 = arith.constant 0 : index
    %27 = vector.load %arg1[%c1, %c0_10, %c0_11] : memref<4x8x32xf32, #tpu.memory_space<vmem>>, vector<1x8x32xf32>
    %28 = vector.shape_cast %27 : vector<1x8x32xf32> to vector<8x32xf32>
    %c2 = arith.constant 2 : index
    %c0_12 = arith.constant 0 : index
    %c0_13 = arith.constant 0 : index
    %29 = vector.load %arg1[%c2, %c0_12, %c0_13] : memref<4x8x32xf32, #tpu.memory_space<vmem>>, vector<1x8x32xf32>
    %30 = vector.shape_cast %29 : vector<1x8x32xf32> to vector<8x32xf32>
    %c3 = arith.constant 3 : index
    %c0_14 = arith.constant 0 : index
    %c0_15 = arith.constant 0 : index
    %31 = vector.load %arg1[%c3, %c0_14, %c0_15] : memref<4x8x32xf32, #tpu.memory_space<vmem>>, vector<1x8x32xf32>
    %32 = vector.shape_cast %31 : vector<1x8x32xf32> to vector<8x32xf32>
    %33 = vector.extract_strided_slice %22 {offsets = [0, 0], sizes = [8, 128], strides = [1, 1]} : vector<64x128xf32> to vector<8x128xf32>
    %34 = arith.truncf %26 : vector<8x32xf32> to vector<8x32xbf16>
    %cst_16 = arith.constant dense<0.000000e+00> : vector<8x128xf32>
    %35 = tpu.matmul %34, %10, %cst_16 {dimension_numbers = #tpu.dot_dimension_numbers<[1], [0], [0], [1], [0, 0, 1, 1], [], []>} : vector<8x32xbf16>, vector<32x128xbf16>, vector<8x128xf32> -> vector<8x128xf32>
    %36 = arith.addf %33, %35 : vector<8x128xf32>
    %37 = arith.negf %36 : vector<8x128xf32>
    %38 = math.exp %37 : vector<8x128xf32>
    %cst_17 = arith.constant 1.000000e+00 : f32
    %39 = vector.broadcast %cst_17 : f32 to vector<8x128xf32>
    %40 = arith.addf %39, %38 : vector<8x128xf32>
    %41 = arith.divf %39, %40 : vector<8x128xf32>
    %42 = vector.extract_strided_slice %41 {offsets = [0, 0], sizes = [8, 32], strides = [1, 1]} : vector<8x128xf32> to vector<8x32xf32>
    %43 = vector.extract_strided_slice %41 {offsets = [0, 32], sizes = [8, 32], strides = [1, 1]} : vector<8x128xf32> to vector<8x32xf32>
    %44 = vector.extract_strided_slice %41 {offsets = [0, 96], sizes = [8, 32], strides = [1, 1]} : vector<8x128xf32> to vector<8x32xf32>
    %45 = vector.extract_strided_slice %36 {offsets = [0, 64], sizes = [8, 32], strides = [1, 1]} : vector<8x128xf32> to vector<8x32xf32>
    %46 = math.tanh %45 : vector<8x32xf32>
    %47 = arith.mulf %43, %30 : vector<8x32xf32>
    %48 = arith.mulf %42, %46 : vector<8x32xf32>
    %49 = arith.addf %47, %48 : vector<8x32xf32>
    %50 = math.tanh %49 : vector<8x32xf32>
    %51 = arith.mulf %44, %50 : vector<8x32xf32>
    %52 = arith.truncf %51 : vector<8x32xf32> to vector<8x32xbf16>
    %cst_18 = arith.constant dense<0.000000e+00> : vector<8x128xf32>
    %53 = tpu.matmul %52, %11, %cst_18 {dimension_numbers = #tpu.dot_dimension_numbers<[1], [0], [0], [1], [0, 0, 1, 1], [], []>} : vector<8x32xbf16>, vector<32x128xbf16>, vector<8x128xf32> -> vector<8x128xf32>
    %54 = arith.truncf %28 : vector<8x32xf32> to vector<8x32xbf16>
    %cst_19 = arith.constant dense<0.000000e+00> : vector<8x128xf32>
    %55 = tpu.matmul %54, %12, %cst_19 {dimension_numbers = #tpu.dot_dimension_numbers<[1], [0], [0], [1], [0, 0, 1, 1], [], []>} : vector<8x32xbf16>, vector<32x128xbf16>, vector<8x128xf32> -> vector<8x128xf32>
    %56 = arith.addf %53, %55 : vector<8x128xf32>
    %57 = arith.addf %56, %24 : vector<8x128xf32>
    %58 = arith.negf %57 : vector<8x128xf32>
    %59 = math.exp %58 : vector<8x128xf32>
    %cst_20 = arith.constant 1.000000e+00 : f32
    %60 = vector.broadcast %cst_20 : f32 to vector<8x128xf32>
    %61 = arith.addf %60, %59 : vector<8x128xf32>
    %62 = arith.divf %60, %61 : vector<8x128xf32>
    %63 = vector.extract_strided_slice %62 {offsets = [0, 0], sizes = [8, 32], strides = [1, 1]} : vector<8x128xf32> to vector<8x32xf32>
    %64 = vector.extract_strided_slice %62 {offsets = [0, 32], sizes = [8, 32], strides = [1, 1]} : vector<8x128xf32> to vector<8x32xf32>
    %65 = vector.extract_strided_slice %62 {offsets = [0, 96], sizes = [8, 32], strides = [1, 1]} : vector<8x128xf32> to vector<8x32xf32>
    %66 = vector.extract_strided_slice %57 {offsets = [0, 64], sizes = [8, 32], strides = [1, 1]} : vector<8x128xf32> to vector<8x32xf32>
    %67 = math.tanh %66 : vector<8x32xf32>
    %68 = arith.mulf %64, %32 : vector<8x32xf32>
    %69 = arith.mulf %63, %67 : vector<8x32xf32>
    %70 = arith.addf %68, %69 : vector<8x32xf32>
    %71 = math.tanh %70 : vector<8x32xf32>
    %72 = arith.mulf %65, %71 : vector<8x32xf32>
    %73 = vector.extract_strided_slice %22 {offsets = [8, 0], sizes = [8, 128], strides = [1, 1]} : vector<64x128xf32> to vector<8x128xf32>
    %74 = arith.truncf %51 : vector<8x32xf32> to vector<8x32xbf16>
    %cst_21 = arith.constant dense<0.000000e+00> : vector<8x128xf32>
    %75 = tpu.matmul %74, %10, %cst_21 {dimension_numbers = #tpu.dot_dimension_numbers<[1], [0], [0], [1], [0, 0, 1, 1], [], []>} : vector<8x32xbf16>, vector<32x128xbf16>, vector<8x128xf32> -> vector<8x128xf32>
    %76 = arith.addf %73, %75 : vector<8x128xf32>
    %77 = arith.negf %76 : vector<8x128xf32>
    %78 = math.exp %77 : vector<8x128xf32>
    %cst_22 = arith.constant 1.000000e+00 : f32
    %79 = vector.broadcast %cst_22 : f32 to vector<8x128xf32>
    %80 = arith.addf %79, %78 : vector<8x128xf32>
    %81 = arith.divf %79, %80 : vector<8x128xf32>
    %82 = vector.extract_strided_slice %81 {offsets = [0, 0], sizes = [8, 32], strides = [1, 1]} : vector<8x128xf32> to vector<8x32xf32>
    %83 = vector.extract_strided_slice %81 {offsets = [0, 32], sizes = [8, 32], strides = [1, 1]} : vector<8x128xf32> to vector<8x32xf32>
    %84 = vector.extract_strided_slice %81 {offsets = [0, 96], sizes = [8, 32], strides = [1, 1]} : vector<8x128xf32> to vector<8x32xf32>
    %85 = vector.extract_strided_slice %76 {offsets = [0, 64], sizes = [8, 32], strides = [1, 1]} : vector<8x128xf32> to vector<8x32xf32>
    %86 = math.tanh %85 : vector<8x32xf32>
    %87 = arith.mulf %83, %49 : vector<8x32xf32>
    %88 = arith.mulf %82, %86 : vector<8x32xf32>
    %89 = arith.addf %87, %88 : vector<8x32xf32>
    %90 = math.tanh %89 : vector<8x32xf32>
    %91 = arith.mulf %84, %90 : vector<8x32xf32>
    %92 = arith.truncf %91 : vector<8x32xf32> to vector<8x32xbf16>
    %cst_23 = arith.constant dense<0.000000e+00> : vector<8x128xf32>
    %93 = tpu.matmul %92, %11, %cst_23 {dimension_numbers = #tpu.dot_dimension_numbers<[1], [0], [0], [1], [0, 0, 1, 1], [], []>} : vector<8x32xbf16>, vector<32x128xbf16>, vector<8x128xf32> -> vector<8x128xf32>
    %94 = arith.truncf %72 : vector<8x32xf32> to vector<8x32xbf16>
    %cst_24 = arith.constant dense<0.000000e+00> : vector<8x128xf32>
    %95 = tpu.matmul %94, %12, %cst_24 {dimension_numbers = #tpu.dot_dimension_numbers<[1], [0], [0], [1], [0, 0, 1, 1], [], []>} : vector<8x32xbf16>, vector<32x128xbf16>, vector<8x128xf32> -> vector<8x128xf32>
    %96 = arith.addf %93, %95 : vector<8x128xf32>
    %97 = arith.addf %96, %24 : vector<8x128xf32>
    %98 = arith.negf %97 : vector<8x128xf32>
    %99 = math.exp %98 : vector<8x128xf32>
    %cst_25 = arith.constant 1.000000e+00 : f32
    %100 = vector.broadcast %cst_25 : f32 to vector<8x128xf32>
    %101 = arith.addf %100, %99 : vector<8x128xf32>
    %102 = arith.divf %100, %101 : vector<8x128xf32>
    %103 = vector.extract_strided_slice %102 {offsets = [0, 0], sizes = [8, 32], strides = [1, 1]} : vector<8x128xf32> to vector<8x32xf32>
    %104 = vector.extract_strided_slice %102 {offsets = [0, 32], sizes = [8, 32], strides = [1, 1]} : vector<8x128xf32> to vector<8x32xf32>
    %105 = vector.extract_strided_slice %102 {offsets = [0, 96], sizes = [8, 32], strides = [1, 1]} : vector<8x128xf32> to vector<8x32xf32>
    %106 = vector.extract_strided_slice %97 {offsets = [0, 64], sizes = [8, 32], strides = [1, 1]} : vector<8x128xf32> to vector<8x32xf32>
    %107 = math.tanh %106 : vector<8x32xf32>
    %108 = arith.mulf %104, %70 : vector<8x32xf32>
    %109 = arith.mulf %103, %107 : vector<8x32xf32>
    %110 = arith.addf %108, %109 : vector<8x32xf32>
    %111 = math.tanh %110 : vector<8x32xf32>
    %112 = arith.mulf %105, %111 : vector<8x32xf32>
    %113 = vector.extract_strided_slice %22 {offsets = [16, 0], sizes = [8, 128], strides = [1, 1]} : vector<64x128xf32> to vector<8x128xf32>
    %114 = arith.truncf %91 : vector<8x32xf32> to vector<8x32xbf16>
    %cst_26 = arith.constant dense<0.000000e+00> : vector<8x128xf32>
    %115 = tpu.matmul %114, %10, %cst_26 {dimension_numbers = #tpu.dot_dimension_numbers<[1], [0], [0], [1], [0, 0, 1, 1], [], []>} : vector<8x32xbf16>, vector<32x128xbf16>, vector<8x128xf32> -> vector<8x128xf32>
    %116 = arith.addf %113, %115 : vector<8x128xf32>
    %117 = arith.negf %116 : vector<8x128xf32>
    %118 = math.exp %117 : vector<8x128xf32>
    %cst_27 = arith.constant 1.000000e+00 : f32
    %119 = vector.broadcast %cst_27 : f32 to vector<8x128xf32>
    %120 = arith.addf %119, %118 : vector<8x128xf32>
    %121 = arith.divf %119, %120 : vector<8x128xf32>
    %122 = vector.extract_strided_slice %121 {offsets = [0, 0], sizes = [8, 32], strides = [1, 1]} : vector<8x128xf32> to vector<8x32xf32>
    %123 = vector.extract_strided_slice %121 {offsets = [0, 32], sizes = [8, 32], strides = [1, 1]} : vector<8x128xf32> to vector<8x32xf32>
    %124 = vector.extract_strided_slice %121 {offsets = [0, 96], sizes = [8, 32], strides = [1, 1]} : vector<8x128xf32> to vector<8x32xf32>
    %125 = vector.extract_strided_slice %116 {offsets = [0, 64], sizes = [8, 32], strides = [1, 1]} : vector<8x128xf32> to vector<8x32xf32>
    %126 = math.tanh %125 : vector<8x32xf32>
    %127 = arith.mulf %123, %89 : vector<8x32xf32>
    %128 = arith.mulf %122, %126 : vector<8x32xf32>
    %129 = arith.addf %127, %128 : vector<8x32xf32>
    %130 = math.tanh %129 : vector<8x32xf32>
    %131 = arith.mulf %124, %130 : vector<8x32xf32>
    %132 = arith.truncf %131 : vector<8x32xf32> to vector<8x32xbf16>
    %cst_28 = arith.constant dense<0.000000e+00> : vector<8x128xf32>
    %133 = tpu.matmul %132, %11, %cst_28 {dimension_numbers = #tpu.dot_dimension_numbers<[1], [0], [0], [1], [0, 0, 1, 1], [], []>} : vector<8x32xbf16>, vector<32x128xbf16>, vector<8x128xf32> -> vector<8x128xf32>
    %134 = arith.truncf %112 : vector<8x32xf32> to vector<8x32xbf16>
    %cst_29 = arith.constant dense<0.000000e+00> : vector<8x128xf32>
    %135 = tpu.matmul %134, %12, %cst_29 {dimension_numbers = #tpu.dot_dimension_numbers<[1], [0], [0], [1], [0, 0, 1, 1], [], []>} : vector<8x32xbf16>, vector<32x128xbf16>, vector<8x128xf32> -> vector<8x128xf32>
    %136 = arith.addf %133, %135 : vector<8x128xf32>
    %137 = arith.addf %136, %24 : vector<8x128xf32>
    %138 = arith.negf %137 : vector<8x128xf32>
    %139 = math.exp %138 : vector<8x128xf32>
    %cst_30 = arith.constant 1.000000e+00 : f32
    %140 = vector.broadcast %cst_30 : f32 to vector<8x128xf32>
    %141 = arith.addf %140, %139 : vector<8x128xf32>
    %142 = arith.divf %140, %141 : vector<8x128xf32>
    %143 = vector.extract_strided_slice %142 {offsets = [0, 0], sizes = [8, 32], strides = [1, 1]} : vector<8x128xf32> to vector<8x32xf32>
    %144 = vector.extract_strided_slice %142 {offsets = [0, 32], sizes = [8, 32], strides = [1, 1]} : vector<8x128xf32> to vector<8x32xf32>
    %145 = vector.extract_strided_slice %142 {offsets = [0, 96], sizes = [8, 32], strides = [1, 1]} : vector<8x128xf32> to vector<8x32xf32>
    %146 = vector.extract_strided_slice %137 {offsets = [0, 64], sizes = [8, 32], strides = [1, 1]} : vector<8x128xf32> to vector<8x32xf32>
    %147 = math.tanh %146 : vector<8x32xf32>
    %148 = arith.mulf %144, %110 : vector<8x32xf32>
    %149 = arith.mulf %143, %147 : vector<8x32xf32>
    %150 = arith.addf %148, %149 : vector<8x32xf32>
    %151 = math.tanh %150 : vector<8x32xf32>
    %152 = arith.mulf %145, %151 : vector<8x32xf32>
    %153 = vector.extract_strided_slice %22 {offsets = [24, 0], sizes = [8, 128], strides = [1, 1]} : vector<64x128xf32> to vector<8x128xf32>
    %154 = arith.truncf %131 : vector<8x32xf32> to vector<8x32xbf16>
    %cst_31 = arith.constant dense<0.000000e+00> : vector<8x128xf32>
    %155 = tpu.matmul %154, %10, %cst_31 {dimension_numbers = #tpu.dot_dimension_numbers<[1], [0], [0], [1], [0, 0, 1, 1], [], []>} : vector<8x32xbf16>, vector<32x128xbf16>, vector<8x128xf32> -> vector<8x128xf32>
    %156 = arith.addf %153, %155 : vector<8x128xf32>
    %157 = arith.negf %156 : vector<8x128xf32>
    %158 = math.exp %157 : vector<8x128xf32>
    %cst_32 = arith.constant 1.000000e+00 : f32
    %159 = vector.broadcast %cst_32 : f32 to vector<8x128xf32>
    %160 = arith.addf %159, %158 : vector<8x128xf32>
    %161 = arith.divf %159, %160 : vector<8x128xf32>
    %162 = vector.extract_strided_slice %161 {offsets = [0, 0], sizes = [8, 32], strides = [1, 1]} : vector<8x128xf32> to vector<8x32xf32>
    %163 = vector.extract_strided_slice %161 {offsets = [0, 32], sizes = [8, 32], strides = [1, 1]} : vector<8x128xf32> to vector<8x32xf32>
    %164 = vector.extract_strided_slice %161 {offsets = [0, 96], sizes = [8, 32], strides = [1, 1]} : vector<8x128xf32> to vector<8x32xf32>
    %165 = vector.extract_strided_slice %156 {offsets = [0, 64], sizes = [8, 32], strides = [1, 1]} : vector<8x128xf32> to vector<8x32xf32>
    %166 = math.tanh %165 : vector<8x32xf32>
    %167 = arith.mulf %163, %129 : vector<8x32xf32>
    %168 = arith.mulf %162, %166 : vector<8x32xf32>
    %169 = arith.addf %167, %168 : vector<8x32xf32>
    %170 = math.tanh %169 : vector<8x32xf32>
    %171 = arith.mulf %164, %170 : vector<8x32xf32>
    %172 = arith.truncf %171 : vector<8x32xf32> to vector<8x32xbf16>
    %cst_33 = arith.constant dense<0.000000e+00> : vector<8x128xf32>
    %173 = tpu.matmul %172, %11, %cst_33 {dimension_numbers = #tpu.dot_dimension_numbers<[1], [0], [0], [1], [0, 0, 1, 1], [], []>} : vector<8x32xbf16>, vector<32x128xbf16>, vector<8x128xf32> -> vector<8x128xf32>
    %174 = arith.truncf %152 : vector<8x32xf32> to vector<8x32xbf16>
    %cst_34 = arith.constant dense<0.000000e+00> : vector<8x128xf32>
    %175 = tpu.matmul %174, %12, %cst_34 {dimension_numbers = #tpu.dot_dimension_numbers<[1], [0], [0], [1], [0, 0, 1, 1], [], []>} : vector<8x32xbf16>, vector<32x128xbf16>, vector<8x128xf32> -> vector<8x128xf32>
    %176 = arith.addf %173, %175 : vector<8x128xf32>
    %177 = arith.addf %176, %24 : vector<8x128xf32>
    %178 = arith.negf %177 : vector<8x128xf32>
    %179 = math.exp %178 : vector<8x128xf32>
    %cst_35 = arith.constant 1.000000e+00 : f32
    %180 = vector.broadcast %cst_35 : f32 to vector<8x128xf32>
    %181 = arith.addf %180, %179 : vector<8x128xf32>
    %182 = arith.divf %180, %181 : vector<8x128xf32>
    %183 = vector.extract_strided_slice %182 {offsets = [0, 0], sizes = [8, 32], strides = [1, 1]} : vector<8x128xf32> to vector<8x32xf32>
    %184 = vector.extract_strided_slice %182 {offsets = [0, 32], sizes = [8, 32], strides = [1, 1]} : vector<8x128xf32> to vector<8x32xf32>
    %185 = vector.extract_strided_slice %182 {offsets = [0, 96], sizes = [8, 32], strides = [1, 1]} : vector<8x128xf32> to vector<8x32xf32>
    %186 = vector.extract_strided_slice %177 {offsets = [0, 64], sizes = [8, 32], strides = [1, 1]} : vector<8x128xf32> to vector<8x32xf32>
    %187 = math.tanh %186 : vector<8x32xf32>
    %188 = arith.mulf %184, %150 : vector<8x32xf32>
    %189 = arith.mulf %183, %187 : vector<8x32xf32>
    %190 = arith.addf %188, %189 : vector<8x32xf32>
    %191 = math.tanh %190 : vector<8x32xf32>
    %192 = arith.mulf %185, %191 : vector<8x32xf32>
    %193 = vector.extract_strided_slice %22 {offsets = [32, 0], sizes = [8, 128], strides = [1, 1]} : vector<64x128xf32> to vector<8x128xf32>
    %194 = arith.truncf %171 : vector<8x32xf32> to vector<8x32xbf16>
    %cst_36 = arith.constant dense<0.000000e+00> : vector<8x128xf32>
    %195 = tpu.matmul %194, %10, %cst_36 {dimension_numbers = #tpu.dot_dimension_numbers<[1], [0], [0], [1], [0, 0, 1, 1], [], []>} : vector<8x32xbf16>, vector<32x128xbf16>, vector<8x128xf32> -> vector<8x128xf32>
    %196 = arith.addf %193, %195 : vector<8x128xf32>
    %197 = arith.negf %196 : vector<8x128xf32>
    %198 = math.exp %197 : vector<8x128xf32>
    %cst_37 = arith.constant 1.000000e+00 : f32
    %199 = vector.broadcast %cst_37 : f32 to vector<8x128xf32>
    %200 = arith.addf %199, %198 : vector<8x128xf32>
    %201 = arith.divf %199, %200 : vector<8x128xf32>
    %202 = vector.extract_strided_slice %201 {offsets = [0, 0], sizes = [8, 32], strides = [1, 1]} : vector<8x128xf32> to vector<8x32xf32>
    %203 = vector.extract_strided_slice %201 {offsets = [0, 32], sizes = [8, 32], strides = [1, 1]} : vector<8x128xf32> to vector<8x32xf32>
    %204 = vector.extract_strided_slice %201 {offsets = [0, 96], sizes = [8, 32], strides = [1, 1]} : vector<8x128xf32> to vector<8x32xf32>
    %205 = vector.extract_strided_slice %196 {offsets = [0, 64], sizes = [8, 32], strides = [1, 1]} : vector<8x128xf32> to vector<8x32xf32>
    %206 = math.tanh %205 : vector<8x32xf32>
    %207 = arith.mulf %203, %169 : vector<8x32xf32>
    %208 = arith.mulf %202, %206 : vector<8x32xf32>
    %209 = arith.addf %207, %208 : vector<8x32xf32>
    %210 = math.tanh %209 : vector<8x32xf32>
    %211 = arith.mulf %204, %210 : vector<8x32xf32>
    %212 = arith.truncf %211 : vector<8x32xf32> to vector<8x32xbf16>
    %cst_38 = arith.constant dense<0.000000e+00> : vector<8x128xf32>
    %213 = tpu.matmul %212, %11, %cst_38 {dimension_numbers = #tpu.dot_dimension_numbers<[1], [0], [0], [1], [0, 0, 1, 1], [], []>} : vector<8x32xbf16>, vector<32x128xbf16>, vector<8x128xf32> -> vector<8x128xf32>
    %214 = arith.truncf %192 : vector<8x32xf32> to vector<8x32xbf16>
    %cst_39 = arith.constant dense<0.000000e+00> : vector<8x128xf32>
    %215 = tpu.matmul %214, %12, %cst_39 {dimension_numbers = #tpu.dot_dimension_numbers<[1], [0], [0], [1], [0, 0, 1, 1], [], []>} : vector<8x32xbf16>, vector<32x128xbf16>, vector<8x128xf32> -> vector<8x128xf32>
    %216 = arith.addf %213, %215 : vector<8x128xf32>
    %217 = arith.addf %216, %24 : vector<8x128xf32>
    %218 = arith.negf %217 : vector<8x128xf32>
    %219 = math.exp %218 : vector<8x128xf32>
    %cst_40 = arith.constant 1.000000e+00 : f32
    %220 = vector.broadcast %cst_40 : f32 to vector<8x128xf32>
    %221 = arith.addf %220, %219 : vector<8x128xf32>
    %222 = arith.divf %220, %221 : vector<8x128xf32>
    %223 = vector.extract_strided_slice %222 {offsets = [0, 0], sizes = [8, 32], strides = [1, 1]} : vector<8x128xf32> to vector<8x32xf32>
    %224 = vector.extract_strided_slice %222 {offsets = [0, 32], sizes = [8, 32], strides = [1, 1]} : vector<8x128xf32> to vector<8x32xf32>
    %225 = vector.extract_strided_slice %222 {offsets = [0, 96], sizes = [8, 32], strides = [1, 1]} : vector<8x128xf32> to vector<8x32xf32>
    %226 = vector.extract_strided_slice %217 {offsets = [0, 64], sizes = [8, 32], strides = [1, 1]} : vector<8x128xf32> to vector<8x32xf32>
    %227 = math.tanh %226 : vector<8x32xf32>
    %228 = arith.mulf %224, %190 : vector<8x32xf32>
    %229 = arith.mulf %223, %227 : vector<8x32xf32>
    %230 = arith.addf %228, %229 : vector<8x32xf32>
    %231 = math.tanh %230 : vector<8x32xf32>
    %232 = arith.mulf %225, %231 : vector<8x32xf32>
    %233 = vector.extract_strided_slice %22 {offsets = [40, 0], sizes = [8, 128], strides = [1, 1]} : vector<64x128xf32> to vector<8x128xf32>
    %234 = arith.truncf %211 : vector<8x32xf32> to vector<8x32xbf16>
    %cst_41 = arith.constant dense<0.000000e+00> : vector<8x128xf32>
    %235 = tpu.matmul %234, %10, %cst_41 {dimension_numbers = #tpu.dot_dimension_numbers<[1], [0], [0], [1], [0, 0, 1, 1], [], []>} : vector<8x32xbf16>, vector<32x128xbf16>, vector<8x128xf32> -> vector<8x128xf32>
    %236 = arith.addf %233, %235 : vector<8x128xf32>
    %237 = arith.negf %236 : vector<8x128xf32>
    %238 = math.exp %237 : vector<8x128xf32>
    %cst_42 = arith.constant 1.000000e+00 : f32
    %239 = vector.broadcast %cst_42 : f32 to vector<8x128xf32>
    %240 = arith.addf %239, %238 : vector<8x128xf32>
    %241 = arith.divf %239, %240 : vector<8x128xf32>
    %242 = vector.extract_strided_slice %241 {offsets = [0, 0], sizes = [8, 32], strides = [1, 1]} : vector<8x128xf32> to vector<8x32xf32>
    %243 = vector.extract_strided_slice %241 {offsets = [0, 32], sizes = [8, 32], strides = [1, 1]} : vector<8x128xf32> to vector<8x32xf32>
    %244 = vector.extract_strided_slice %241 {offsets = [0, 96], sizes = [8, 32], strides = [1, 1]} : vector<8x128xf32> to vector<8x32xf32>
    %245 = vector.extract_strided_slice %236 {offsets = [0, 64], sizes = [8, 32], strides = [1, 1]} : vector<8x128xf32> to vector<8x32xf32>
    %246 = math.tanh %245 : vector<8x32xf32>
    %247 = arith.mulf %243, %209 : vector<8x32xf32>
    %248 = arith.mulf %242, %246 : vector<8x32xf32>
    %249 = arith.addf %247, %248 : vector<8x32xf32>
    %250 = math.tanh %249 : vector<8x32xf32>
    %251 = arith.mulf %244, %250 : vector<8x32xf32>
    %252 = arith.truncf %251 : vector<8x32xf32> to vector<8x32xbf16>
    %cst_43 = arith.constant dense<0.000000e+00> : vector<8x128xf32>
    %253 = tpu.matmul %252, %11, %cst_43 {dimension_numbers = #tpu.dot_dimension_numbers<[1], [0], [0], [1], [0, 0, 1, 1], [], []>} : vector<8x32xbf16>, vector<32x128xbf16>, vector<8x128xf32> -> vector<8x128xf32>
    %254 = arith.truncf %232 : vector<8x32xf32> to vector<8x32xbf16>
    %cst_44 = arith.constant dense<0.000000e+00> : vector<8x128xf32>
    %255 = tpu.matmul %254, %12, %cst_44 {dimension_numbers = #tpu.dot_dimension_numbers<[1], [0], [0], [1], [0, 0, 1, 1], [], []>} : vector<8x32xbf16>, vector<32x128xbf16>, vector<8x128xf32> -> vector<8x128xf32>
    %256 = arith.addf %253, %255 : vector<8x128xf32>
    %257 = arith.addf %256, %24 : vector<8x128xf32>
    %258 = arith.negf %257 : vector<8x128xf32>
    %259 = math.exp %258 : vector<8x128xf32>
    %cst_45 = arith.constant 1.000000e+00 : f32
    %260 = vector.broadcast %cst_45 : f32 to vector<8x128xf32>
    %261 = arith.addf %260, %259 : vector<8x128xf32>
    %262 = arith.divf %260, %261 : vector<8x128xf32>
    %263 = vector.extract_strided_slice %262 {offsets = [0, 0], sizes = [8, 32], strides = [1, 1]} : vector<8x128xf32> to vector<8x32xf32>
    %264 = vector.extract_strided_slice %262 {offsets = [0, 32], sizes = [8, 32], strides = [1, 1]} : vector<8x128xf32> to vector<8x32xf32>
    %265 = vector.extract_strided_slice %262 {offsets = [0, 96], sizes = [8, 32], strides = [1, 1]} : vector<8x128xf32> to vector<8x32xf32>
    %266 = vector.extract_strided_slice %257 {offsets = [0, 64], sizes = [8, 32], strides = [1, 1]} : vector<8x128xf32> to vector<8x32xf32>
    %267 = math.tanh %266 : vector<8x32xf32>
    %268 = arith.mulf %264, %230 : vector<8x32xf32>
    %269 = arith.mulf %263, %267 : vector<8x32xf32>
    %270 = arith.addf %268, %269 : vector<8x32xf32>
    %271 = math.tanh %270 : vector<8x32xf32>
    %272 = arith.mulf %265, %271 : vector<8x32xf32>
    %273 = vector.extract_strided_slice %22 {offsets = [48, 0], sizes = [8, 128], strides = [1, 1]} : vector<64x128xf32> to vector<8x128xf32>
    %274 = arith.truncf %251 : vector<8x32xf32> to vector<8x32xbf16>
    %cst_46 = arith.constant dense<0.000000e+00> : vector<8x128xf32>
    %275 = tpu.matmul %274, %10, %cst_46 {dimension_numbers = #tpu.dot_dimension_numbers<[1], [0], [0], [1], [0, 0, 1, 1], [], []>} : vector<8x32xbf16>, vector<32x128xbf16>, vector<8x128xf32> -> vector<8x128xf32>
    %276 = arith.addf %273, %275 : vector<8x128xf32>
    %277 = arith.negf %276 : vector<8x128xf32>
    %278 = math.exp %277 : vector<8x128xf32>
    %cst_47 = arith.constant 1.000000e+00 : f32
    %279 = vector.broadcast %cst_47 : f32 to vector<8x128xf32>
    %280 = arith.addf %279, %278 : vector<8x128xf32>
    %281 = arith.divf %279, %280 : vector<8x128xf32>
    %282 = vector.extract_strided_slice %281 {offsets = [0, 0], sizes = [8, 32], strides = [1, 1]} : vector<8x128xf32> to vector<8x32xf32>
    %283 = vector.extract_strided_slice %281 {offsets = [0, 32], sizes = [8, 32], strides = [1, 1]} : vector<8x128xf32> to vector<8x32xf32>
    %284 = vector.extract_strided_slice %281 {offsets = [0, 96], sizes = [8, 32], strides = [1, 1]} : vector<8x128xf32> to vector<8x32xf32>
    %285 = vector.extract_strided_slice %276 {offsets = [0, 64], sizes = [8, 32], strides = [1, 1]} : vector<8x128xf32> to vector<8x32xf32>
    %286 = math.tanh %285 : vector<8x32xf32>
    %287 = arith.mulf %283, %249 : vector<8x32xf32>
    %288 = arith.mulf %282, %286 : vector<8x32xf32>
    %289 = arith.addf %287, %288 : vector<8x32xf32>
    %290 = math.tanh %289 : vector<8x32xf32>
    %291 = arith.mulf %284, %290 : vector<8x32xf32>
    %292 = arith.truncf %291 : vector<8x32xf32> to vector<8x32xbf16>
    %cst_48 = arith.constant dense<0.000000e+00> : vector<8x128xf32>
    %293 = tpu.matmul %292, %11, %cst_48 {dimension_numbers = #tpu.dot_dimension_numbers<[1], [0], [0], [1], [0, 0, 1, 1], [], []>} : vector<8x32xbf16>, vector<32x128xbf16>, vector<8x128xf32> -> vector<8x128xf32>
    %294 = arith.truncf %272 : vector<8x32xf32> to vector<8x32xbf16>
    %cst_49 = arith.constant dense<0.000000e+00> : vector<8x128xf32>
    %295 = tpu.matmul %294, %12, %cst_49 {dimension_numbers = #tpu.dot_dimension_numbers<[1], [0], [0], [1], [0, 0, 1, 1], [], []>} : vector<8x32xbf16>, vector<32x128xbf16>, vector<8x128xf32> -> vector<8x128xf32>
    %296 = arith.addf %293, %295 : vector<8x128xf32>
    %297 = arith.addf %296, %24 : vector<8x128xf32>
    %298 = arith.negf %297 : vector<8x128xf32>
    %299 = math.exp %298 : vector<8x128xf32>
    %cst_50 = arith.constant 1.000000e+00 : f32
    %300 = vector.broadcast %cst_50 : f32 to vector<8x128xf32>
    %301 = arith.addf %300, %299 : vector<8x128xf32>
    %302 = arith.divf %300, %301 : vector<8x128xf32>
    %303 = vector.extract_strided_slice %302 {offsets = [0, 0], sizes = [8, 32], strides = [1, 1]} : vector<8x128xf32> to vector<8x32xf32>
    %304 = vector.extract_strided_slice %302 {offsets = [0, 32], sizes = [8, 32], strides = [1, 1]} : vector<8x128xf32> to vector<8x32xf32>
    %305 = vector.extract_strided_slice %302 {offsets = [0, 96], sizes = [8, 32], strides = [1, 1]} : vector<8x128xf32> to vector<8x32xf32>
    %306 = vector.extract_strided_slice %297 {offsets = [0, 64], sizes = [8, 32], strides = [1, 1]} : vector<8x128xf32> to vector<8x32xf32>
    %307 = math.tanh %306 : vector<8x32xf32>
    %308 = arith.mulf %304, %270 : vector<8x32xf32>
    %309 = arith.mulf %303, %307 : vector<8x32xf32>
    %310 = arith.addf %308, %309 : vector<8x32xf32>
    %311 = math.tanh %310 : vector<8x32xf32>
    %312 = arith.mulf %305, %311 : vector<8x32xf32>
    %313 = vector.extract_strided_slice %22 {offsets = [56, 0], sizes = [8, 128], strides = [1, 1]} : vector<64x128xf32> to vector<8x128xf32>
    %314 = arith.truncf %291 : vector<8x32xf32> to vector<8x32xbf16>
    %cst_51 = arith.constant dense<0.000000e+00> : vector<8x128xf32>
    %315 = tpu.matmul %314, %10, %cst_51 {dimension_numbers = #tpu.dot_dimension_numbers<[1], [0], [0], [1], [0, 0, 1, 1], [], []>} : vector<8x32xbf16>, vector<32x128xbf16>, vector<8x128xf32> -> vector<8x128xf32>
    %316 = arith.addf %313, %315 : vector<8x128xf32>
    %317 = arith.negf %316 : vector<8x128xf32>
    %318 = math.exp %317 : vector<8x128xf32>
    %cst_52 = arith.constant 1.000000e+00 : f32
    %319 = vector.broadcast %cst_52 : f32 to vector<8x128xf32>
    %320 = arith.addf %319, %318 : vector<8x128xf32>
    %321 = arith.divf %319, %320 : vector<8x128xf32>
    %322 = vector.extract_strided_slice %321 {offsets = [0, 0], sizes = [8, 32], strides = [1, 1]} : vector<8x128xf32> to vector<8x32xf32>
    %323 = vector.extract_strided_slice %321 {offsets = [0, 32], sizes = [8, 32], strides = [1, 1]} : vector<8x128xf32> to vector<8x32xf32>
    %324 = vector.extract_strided_slice %321 {offsets = [0, 96], sizes = [8, 32], strides = [1, 1]} : vector<8x128xf32> to vector<8x32xf32>
    %325 = vector.extract_strided_slice %316 {offsets = [0, 64], sizes = [8, 32], strides = [1, 1]} : vector<8x128xf32> to vector<8x32xf32>
    %326 = math.tanh %325 : vector<8x32xf32>
    %327 = arith.mulf %323, %289 : vector<8x32xf32>
    %328 = arith.mulf %322, %326 : vector<8x32xf32>
    %329 = arith.addf %327, %328 : vector<8x32xf32>
    %330 = math.tanh %329 : vector<8x32xf32>
    %331 = arith.mulf %324, %330 : vector<8x32xf32>
    %332 = arith.truncf %331 : vector<8x32xf32> to vector<8x32xbf16>
    %cst_53 = arith.constant dense<0.000000e+00> : vector<8x128xf32>
    %333 = tpu.matmul %332, %11, %cst_53 {dimension_numbers = #tpu.dot_dimension_numbers<[1], [0], [0], [1], [0, 0, 1, 1], [], []>} : vector<8x32xbf16>, vector<32x128xbf16>, vector<8x128xf32> -> vector<8x128xf32>
    %334 = arith.truncf %312 : vector<8x32xf32> to vector<8x32xbf16>
    %cst_54 = arith.constant dense<0.000000e+00> : vector<8x128xf32>
    %335 = tpu.matmul %334, %12, %cst_54 {dimension_numbers = #tpu.dot_dimension_numbers<[1], [0], [0], [1], [0, 0, 1, 1], [], []>} : vector<8x32xbf16>, vector<32x128xbf16>, vector<8x128xf32> -> vector<8x128xf32>
    %336 = arith.addf %333, %335 : vector<8x128xf32>
    %337 = arith.addf %336, %24 : vector<8x128xf32>
    %338 = arith.negf %337 : vector<8x128xf32>
    %339 = math.exp %338 : vector<8x128xf32>
    %cst_55 = arith.constant 1.000000e+00 : f32
    %340 = vector.broadcast %cst_55 : f32 to vector<8x128xf32>
    %341 = arith.addf %340, %339 : vector<8x128xf32>
    %342 = arith.divf %340, %341 : vector<8x128xf32>
    %343 = vector.extract_strided_slice %342 {offsets = [0, 0], sizes = [8, 32], strides = [1, 1]} : vector<8x128xf32> to vector<8x32xf32>
    %344 = vector.extract_strided_slice %342 {offsets = [0, 32], sizes = [8, 32], strides = [1, 1]} : vector<8x128xf32> to vector<8x32xf32>
    %345 = vector.extract_strided_slice %342 {offsets = [0, 96], sizes = [8, 32], strides = [1, 1]} : vector<8x128xf32> to vector<8x32xf32>
    %346 = vector.extract_strided_slice %337 {offsets = [0, 64], sizes = [8, 32], strides = [1, 1]} : vector<8x128xf32> to vector<8x32xf32>
    %347 = math.tanh %346 : vector<8x32xf32>
    %348 = arith.mulf %344, %310 : vector<8x32xf32>
    %349 = arith.mulf %343, %347 : vector<8x32xf32>
    %350 = arith.addf %348, %349 : vector<8x32xf32>
    %351 = math.tanh %350 : vector<8x32xf32>
    %352 = arith.mulf %345, %351 : vector<8x32xf32>
    %353 = vector.broadcast %6 : vector<1x32xf32> to vector<8x32xf32>
    %354 = arith.mulf %352, %353 : vector<8x32xf32>
    %cst_56 = arith.constant dense<0.000000e+00> : vector<8xf32>
    %355 = vector.multi_reduction <add>, %354, %cst_56 [1] : vector<8x32xf32> to vector<8xf32>
    %356 = vector.shape_cast %355 : vector<8xf32> to vector<8x1xf32>
    %357 = vector.broadcast %7 : vector<1x1xf32> to vector<8x1xf32>
    %358 = arith.addf %356, %357 : vector<8x1xf32>
    %c0_57 = arith.constant 0 : index
    %c0_58 = arith.constant 0 : index
    %359 = vector.load %arg4[%c0_57, %c0_58] : memref<8x1xf32, #tpu.memory_space<vmem>>, vector<8x1xf32>
    tpu.vector_store %arg4[%c0_57, %c0_58], %358 {strides = array<i32>} : memref<8x1xf32, #tpu.memory_space<vmem>>, vector<8x1xf32>,
    %c0_59 = arith.constant 0 : index
    %c0_60 = arith.constant 0 : index
    %c0_61 = arith.constant 0 : index
    %360 = vector.load %arg5[%c0_59, %c0_60, %c0_61] : memref<4x8x32xf32, #tpu.memory_space<vmem>>, vector<1x8x32xf32>
    %361 = vector.shape_cast %360 : vector<1x8x32xf32> to vector<8x32xf32>
    %362 = vector.shape_cast %331 : vector<8x32xf32> to vector<1x8x32xf32>
    tpu.vector_store %arg5[%c0_59, %c0_60, %c0_61], %362 {strides = array<i32>} : memref<4x8x32xf32, #tpu.memory_space<vmem>>, vector<1x8x32xf32>,
    %c1_62 = arith.constant 1 : index
    %c0_63 = arith.constant 0 : index
    %c0_64 = arith.constant 0 : index
    %363 = vector.load %arg5[%c1_62, %c0_63, %c0_64] : memref<4x8x32xf32, #tpu.memory_space<vmem>>, vector<1x8x32xf32>
    %364 = vector.shape_cast %363 : vector<1x8x32xf32> to vector<8x32xf32>
    %365 = vector.shape_cast %352 : vector<8x32xf32> to vector<1x8x32xf32>
    tpu.vector_store %arg5[%c1_62, %c0_63, %c0_64], %365 {strides = array<i32>} : memref<4x8x32xf32, #tpu.memory_space<vmem>>, vector<1x8x32xf32>,
    %c2_65 = arith.constant 2 : index
    %c0_66 = arith.constant 0 : index
    %c0_67 = arith.constant 0 : index
    %366 = vector.load %arg5[%c2_65, %c0_66, %c0_67] : memref<4x8x32xf32, #tpu.memory_space<vmem>>, vector<1x8x32xf32>
    %367 = vector.shape_cast %366 : vector<1x8x32xf32> to vector<8x32xf32>
    %368 = vector.shape_cast %329 : vector<8x32xf32> to vector<1x8x32xf32>
    tpu.vector_store %arg5[%c2_65, %c0_66, %c0_67], %368 {strides = array<i32>} : memref<4x8x32xf32, #tpu.memory_space<vmem>>, vector<1x8x32xf32>,
    %c3_68 = arith.constant 3 : index
    %c0_69 = arith.constant 0 : index
    %c0_70 = arith.constant 0 : index
    %369 = vector.load %arg5[%c3_68, %c0_69, %c0_70] : memref<4x8x32xf32, #tpu.memory_space<vmem>>, vector<1x8x32xf32>
    %370 = vector.shape_cast %369 : vector<1x8x32xf32> to vector<8x32xf32>
    %371 = vector.shape_cast %350 : vector<8x32xf32> to vector<1x8x32xf32>
    tpu.vector_store %arg5[%c3_68, %c0_69, %c0_70], %371 {strides = array<i32>} : memref<4x8x32xf32, #tpu.memory_space<vmem>>, vector<1x8x32xf32>,
    return
  }
}

</mosaic_0001>

<bundles_post_ra>
// kernel: rnn_reward_forward.1
= control target key start
LH: loop header
LB: loop body
LE: loop exit
PB: predicated region body
PF: predicated region fallthrough
CT: control target
= control target key end

     0   :  { %vm80_vm0 = vcmask 1041408   ;;  %vm67_vm1 = vcmask 31744   ;;  %vm138_vm2 = vcmask 261120   ;;  %s1562_s7 = smov 64   ;;  %s1563_s10 = smov 32   ;;  %s1934_s3 = inlined_call_operand.vmem [shape: f32[8,128], index: 3, kind: input, shape index: {}]   ;;  %s1935_s2 = inlined_call_operand.vmem [shape: bf16[128,128], index: 2, kind: input, shape index: {}]   ;;  %s1936_s0 = inlined_call_operand.vmem [shape: bf16[64,4], index: 0, kind: input, shape index: {}]   ;;  %s1937_s1 = inlined_call_operand.vmem [shape: f32[4,8,32], index: 1, kind: input, shape index: {}, may-alias: {1,5}]   ;;  %s1938_s5 = inlined_call_operand.vmem [shape: f32[4,8,32], index: 5, kind: output, shape index: {1}, may-alias: {1,5}]   ;;  %s1939_s4 = inlined_call_operand.vmem [shape: f32[8,1], index: 4, kind: output, shape index: {0}]  }
   0x1   :  { %v1598_v0 = vld [vmem:[%s1934_s3] sm:$0xff]  ;;  %v1603_v1 = vld [vmem:[%s1935_s2 + $0x18] sm:$0xff]  ;;  %v1615_v5 = vld [vmem:[%s1935_s2 + $0x10] sm:$0xff]  ;;  %s1564_s28 = smov 96  }
   0x2   :  { %v21_v2 = vpack.c.bf16 %v1598_v0, %v1598_v0  ;;  %210 = vmatpush.bf16.msra.mxu2 %v1603_v1  ;;  %v1426_v4 = vld [vmem:[%s1936_s0] sm:$0xff]  ;;  %v1419_v8 = vld [vmem:[%s1935_s2 + $0x8] sm:$0xff]  ;;  %v1631_v11 = vperm.slane %v1598_v0, 4  ;;  %v1637_v20 = vperm.slane %v1598_v0, 5  ;;  %v1349_v25 = vld [vmem:[%s1937_s1 + $0x10] sm:$0xff]  ;;  %v1702_v60 = vperm.slane %v1598_v0, 6 }
   0x3   :  { %v181_v6 = vld [vmem:[%s1937_s1] sm:$0xff]  ;;  %157 = vmatpush.bf16.msra.mxu1 %v1419_v8  ;;  %v1653_v46 = vld [vmem:[%s1935_s2 + $0x38] sm:$0xff]  ;;  %v1658_v47 = vld [vmem:[%s1935_s2 + $0x28] sm:$0xff] }
   0x4   :  { %v82_v3 = vsel %vm80_vm0, %v21_v2, 0  ;;  %v188_v7 = vpack.c.bf16 %v181_v6, %v181_v6  ;;  %v1418_v9 = vld [vmem:[%s1935_s2] sm:$0xff]  ;;  %282 = vmatpush.bf16.msra.mxu3 %v1653_v46  ;;  %v1664_v48 = vld [vmem:[%s1935_s2 + $0x30] sm:$0xff]  ;;  %v1348_v49 = vld [vmem:[%s1937_s1 + $0x8] sm:$0xff] }
   0x5   :  { %91 = vmatpush.bf16.msra.mxu0 %v82_v3  ;;  %v1674_v50 = vld [vmem:[%s1935_s2 + $0x20] sm:$0xff]  ;;  %v260_v51 = vpack.c.bf16 %v1348_v49, %v1348_v49  ;;  %v1350_v55 = vld [vmem:[%s1937_s1 + $0x18] sm:$0xff] }
   0x6   :  { %211 = vmatpush.bf16.msra.mxu2 %v1615_v5 }
   0x7   :  { %158 = vmatpush.bf16.msra.mxu1 %v1418_v9 }
   0x8   :  { %1332 = vmatmul.msk.bf16.vlgmr.msra.gmra.mxu0 %vm67_vm1, %v1426_v4  ;;  %283 = vmatpush.bf16.msra.mxu3 %v1664_v48 }
   0x9   :  { %1359 = vmatmul.msk.bf16.vlgmr.msra.gmra.mxu2 %vm138_vm2, %v188_v7  ;;  %575 = vmatpush.bf16.msrb.mxu0 %v1658_v47 }
   0xa   :  { %313 = vmatpush.bf16.msrb.mxu2 %v1658_v47 }
   0xb   :  { %626 = vmatpush.bf16.msrb.mxu1 %v1603_v1  ;;  %1369 = vmatmul.msk.bf16.vlgmr.msra.gmra.mxu3 %vm138_vm2, %v260_v51  ;;  %v1427_v51 = vld [vmem:[%s1936_s0 + $0x8] sm:$0xff] }
   0xc   :  { %368 = vmatpush.bf16.msrb.mxu3 %v1603_v1 }
   0xd   :  { %576 = vmatpush.bf16.msrb.mxu0 %v1674_v50 }
   0xe   :  { %314 = vmatpush.bf16.msrb.mxu2 %v1674_v50 }
   0xf   :  { %627 = vmatpush.bf16.msrb.mxu1 %v1615_v5 }
  0x10   :  { %369 = vmatpush.bf16.msrb.mxu3 %v1615_v5 }
  0x11   :  { %755 = vmatpush.bf16.msra.mxu0 %v1603_v1 }
  0x12   :  { %427 = vmatpush.bf16.msra.mxu2 %v1653_v46 }
  0x14   :  { %446 = vmatpush.bf16.msra.mxu3 %v1658_v47 }
  0x15   :  { %756 = vmatpush.bf16.msra.mxu0 %v1615_v5 }
  0x16   :  { %428 = vmatpush.bf16.msra.mxu2 %v1664_v48 }
  0x18   :  { %447 = vmatpush.bf16.msra.mxu3 %v1674_v50  ;;  %1333 = vmatmul.msk.bf16.gmra.mxu0 %vm67_vm1, %v1427_v51 }
  0x85   :  { %v93_v10 = vpop.f32.mrf.mxu0 }
  0x86   :  { %v94_v12 = vadd.f32 %v93_v10, %v1631_v11 }
  0x88   :  { %v113_v15 = vmax.f32 %v94_v12, 0.0 }
  0x8c   :  { %v213_v18 = vpop.f32.mrf.mxu2 }
  0x8d   :  { %v95_v13 = vpop.f32.mrf.mxu0 }
  0x8e   :  { %v96_v14 = vadd.f32 %v95_v13, %v1631_v11  ;;  %v285_v57 = vpop.f32.mrf.mxu3 }
  0x90   :  { %v114_v16 = vmax.f32 %v96_v14, 0.0 }
  0x92   :  { %v121_v17 = vpack.c.bf16 %v114_v16, %v113_v15 }
  0x94   :  { %1344 = vmatmul.msk.bf16.vlgmr.msra.gmra.mxu1 %vm138_vm2, %v121_v17  ;;  %v215_v19 = vpop.f32.mrf.mxu2 }
  0x95   :  { %814 = vmatpush.bf16.msra.mxu1 %v1653_v46 }
  0x96   :  { %v287_v58 = vpop.f32.mrf.mxu3 }
  0x99   :  { %815 = vmatpush.bf16.msra.mxu1 %v1664_v48 }
 0x111   :  { %v160_v21 = vpop.f32.mrf.mxu1 }
 0x112   :  { %v161_v22 = vadd.f32 %v160_v21, %v1637_v20 }
 0x114   :  { %v217_v23 = vadd.f32 %v213_v18, %v161_v22 }
 0x116   :  { %1433 = vtanh.f32 %v217_v23  ;;  %v1360_v26 = vmul.f32 -1.442695, %v217_v23 }
 0x118   :  { %1435 = vpow2.f32 %v1360_v26 }
 0x119   :  { %v162_v59 = vpop.f32.mrf.mxu1 }
 0x11a   :  { %v163_v61 = vadd.f32 %v162_v59, %v1637_v20 }
 0x11c   :  { %v1434_v24 = vpop.eup %1433 }
 0x11d   :  { %244 = vrot.lane.b32.xlu0 %v1434_v24, %s1562_s7 }
 0x11e   :  { %v1436_v27 = vpop.eup %1435 }
 0x11f   :  { %v221_v28 = vadd.f32 1.0, %v1436_v27 }
 0x121   :  { %1437 = vrcp.f32 %v221_v28  ;;  %v233_v34 = vand.u32 2147483648, %v221_v28  ;;  %vm227_vm4 = vweird.f32 %v221_v28  ;;  %v231_v35 = vand.u32 2147483647, %v221_v28 }
 0x123   :  { %v234_v37 = vor.u32 1.1754944e-38, %v233_v34  ;;  %vm232_vm6 = vcmp.eq.f32.partialorder %v231_v35, 8.507059e+37 }
 0x125   :  { %239 = vrot.lane.b32.xlu0 %v1349_v25, %s1563_s10 }
 0x127   :  { %v1438_v29 = vpop.eup %1437 }
 0x128   :  { %v223_v30 = vmul.f32 %v1438_v29, %v221_v28  ;;  %vm228_vm3 = vweird.f32 %v1438_v29 }
 0x129   :  { %vm229_vm5 = vmor %vm227_vm4, %vm228_vm3 }
 0x12a   :  { %v224_v31 = vsub.f32 1.0, %v223_v30 }
 0x12c   :  { %v225_v32 = vmul.f32 %v1438_v29, %v224_v31 }
 0x12e   :  { %v226_v33 = vadd.f32 %v1438_v29, %v225_v32 }
 0x130   :  { %v230_v36 = vsel %vm229_vm5, %v1438_v29, %v226_v33 }
 0x131   :  { %v235_v39 = vsel %vm232_vm6, %v234_v37, %v230_v36 }
 0x18f   :  { %v245_v38 = vpop.permute.xlu0 %244 }
 0x190   :  { %v247_v40 = vmul.f32 %v245_v38, %v235_v39 }
 0x192   :  { %249 = vrot.lane.b32.xlu1 %v247_v40, %s1563_s10 }
 0x197   :  { %v240_v41 = vpop.permute.xlu0 %239 }
 0x198   :  { %v242_v42 = vmul.f32 %v240_v41, %v235_v39 }
 0x204   :  { %v250_v43 = vpop.permute.xlu1 %249 }
 0x205   :  { %v1646_v44 = vadd.f32 %v250_v43, %v242_v42 }
 0x207   :  { %1439 = vtanh.f32 %v1646_v44 }
 0x20d   :  { %v1440_v45 = vpop.eup %1439 }
 0x20e   :  { %255 = vrot.lane.b32.xlu1 %v1440_v45, %s1562_s7 }
 0x216   :  { %342 = vrot.lane.b32.xlu1 %v1350_v55, %s1563_s10 }
 0x280   :  { %v256_v52 = vpop.permute.xlu1 %255 }
 0x281   :  { %v258_v53 = vmul.f32 %v256_v52, %v235_v39 }
 0x283   :  { %v259_v54 = vpack.c.bf16 %v258_v53, %v258_v53 }
 0x285   :  { %290 = vrot.lane.b32.xlu2 %v259_v54, %s1563_s10 }
 0x288   :  { %v343_v41 = vpop.permute.xlu1 %342 }
 0x2df   :  { %v291_v56 = vpop.permute.xlu2 %290 }
 0x2e0   :  { %1378 = vmatmul.msk.bf16.vlgmr.msrb.gmra.mxu2 %vm138_vm2, %v291_v56  ;;  %1380 = vmatmul.msk.bf16.vlgmr.msrb.gmra.mxu3 %vm138_vm2, %v291_v56 }
 0x2e1   :  { %497 = vmatpush.bf16.msrb.mxu2 %v1603_v1  ;;  %556 = vmatpush.bf16.msrb.mxu3 %v1653_v46 }
 0x2e5   :  { %498 = vmatpush.bf16.msrb.mxu2 %v1615_v5  ;;  %557 = vmatpush.bf16.msrb.mxu3 %v1664_v48 }
 0x363   :  { %v316_v62 = vpop.f32.mrf.mxu2  ;;  %v371_v63 = vpop.f32.mrf.mxu3 }
 0x364   :  { %v317_v2 = vadd.f32 %v316_v62, %v285_v57  ;;  %v375_v3 = vadd.f32 %v371_v63, %v163_v61  ;;  %v98_v63 = vpop.f32.mrf.mxu0 }
 0x366   :  { %v320_v4 = vadd.f32 %v317_v2, %v1702_v60  ;;  %1441 = vtanh.f32 %v375_v3  ;;  %v1381_v13 = vmul.f32 -1.442695, %v375_v3 }
 0x368   :  { %1443 = vtanh.f32 %v320_v4  ;;  %v1379_v0 = vmul.f32 -1.442695, %v320_v4 }
 0x36a   :  { %1445 = vpow2.f32 %v1379_v0 }
 0x36b   :  { %v318_v6 = vpop.f32.mrf.mxu2  ;;  %v373_v7 = vpop.f32.mrf.mxu3 }
 0x36c   :  { %v1442_v8 = vpop.eup %1441  ;;  %v100_v2 = vpop.f32.mrf.mxu0 }
 0x36d   :  { %398 = vrot.lane.b32.xlu0 %v1442_v8, %s1562_s7  ;;  %v101_v4 = vadd.f32 %v100_v2, %v1631_v11 }
 0x36e   :  { %v1444_v9 = vpop.eup %1443 }
 0x36f   :  { %347 = vrot.lane.b32.xlu2 %v1444_v9, %s1562_s7  ;;  %v116_v6 = vmax.f32 %v101_v4, 0.0 }
 0x370   :  { %v1446_v10 = vpop.eup %1445 }
 0x371   :  { %v324_v12 = vadd.f32 1.0, %v1446_v10 }
 0x373   :  { %1447 = vrcp.f32 %v324_v12  ;;  %v336_v22 = vand.u32 2147483648, %v324_v12  ;;  %vm330_vm8 = vweird.f32 %v324_v12  ;;  %v334_v23 = vand.u32 2147483647, %v324_v12 }
 0x374   :  { %1449 = vpow2.f32 %v1381_v13 }
 0x375   :  { %v337_v25 = vor.u32 1.1754944e-38, %v336_v22  ;;  %vm335_vm10 = vcmp.eq.f32.partialorder %v334_v23, 8.507059e+37 }
 0x379   :  { %v1448_v14 = vpop.eup %1447 }
 0x37a   :  { %v326_v15 = vmul.f32 %v1448_v14, %v324_v12  ;;  %v1450_v17 = vpop.eup %1449  ;;  %vm331_vm7 = vweird.f32 %v1448_v14 }
 0x37b   :  { %v379_v19 = vadd.f32 1.0, %v1450_v17  ;;  %vm332_vm9 = vmor %vm330_vm8, %vm331_vm7 }
 0x37c   :  { %v327_v16 = vsub.f32 1.0, %v326_v15 }
 0x37d   :  { %1451 = vrcp.f32 %v379_v19  ;;  %v391_v34 = vand.u32 2147483648, %v379_v19  ;;  %vm385_vm12 = vweird.f32 %v379_v19  ;;  %v389_v35 = vand.u32 2147483647, %v379_v19 }
 0x37e   :  { %v328_v18 = vmul.f32 %v1448_v14, %v327_v16 }
 0x37f   :  { %v392_v37 = vor.u32 1.1754944e-38, %v391_v34  ;;  %vm390_vm14 = vcmp.eq.f32.partialorder %v389_v35, 8.507059e+37 }
 0x380   :  { %v329_v21 = vadd.f32 %v1448_v14, %v328_v18 }
 0x382   :  { %v333_v24 = vsel %vm332_vm9, %v1448_v14, %v329_v21 }
 0x383   :  { %v1452_v26 = vpop.eup %1451  ;;  %v338_v27 = vsel %vm335_vm10, %v337_v25, %v333_v24 }
 0x384   :  { %v381_v30 = vmul.f32 %v1452_v26, %v379_v19  ;;  %vm386_vm11 = vweird.f32 %v1452_v26  ;;  %v345_v42 = vmul.f32 %v343_v41, %v338_v27 }
 0x385   :  { %vm387_vm13 = vmor %vm385_vm12, %vm386_vm11 }
 0x386   :  { %v382_v31 = vsub.f32 1.0, %v381_v30 }
 0x388   :  { %v383_v32 = vmul.f32 %v1452_v26, %v382_v31 }
 0x38a   :  { %v384_v33 = vadd.f32 %v1452_v26, %v383_v32 }
 0x38c   :  { %v388_v36 = vsel %vm387_vm13, %v1452_v26, %v384_v33 }
 0x38d   :  { %v393_v39 = vsel %vm390_vm14, %v392_v37, %v388_v36 }
 0x38e   :  { %v396_v52 = vmul.f32 %v393_v39, %v1646_v44  ;;  %v99_v44 = vadd.f32 %v98_v63, %v1631_v11  ;;  %v1429_v63 = vld [vmem:[%s1936_s0 + $0x18] sm:$0xff] }
 0x390   :  { %v115_v3 = vmax.f32 %v99_v44, 0.0 }
 0x392   :  { %v122_v7 = vpack.c.bf16 %v116_v6, %v115_v3 }
 0x394   :  { %1345 = vmatmul.msk.bf16.gmra.mxu1 %vm138_vm2, %v122_v7 }
 0x3c9   :  { %v348_v28 = vpop.permute.xlu2 %347 }
 0x3ca   :  { %v350_v29 = vmul.f32 %v348_v28, %v338_v27 }
 0x3cc   :  { %352 = vrot.lane.b32.xlu2 %v350_v29, %s1563_s10 }
 0x3df   :  { %v399_v38 = vpop.permute.xlu0 %398 }
 0x3e0   :  { %v401_v40 = vmul.f32 %v399_v38, %v393_v39 }
 0x3e2   :  { %403 = vrot.lane.b32.xlu0 %v401_v40, %s1563_s10 }
 0x411   :  { %v165_v12 = vpop.f32.mrf.mxu1 }
 0x412   :  { %v166_v13 = vadd.f32 %v165_v12, %v1637_v20 }
 0x426   :  { %v353_v43 = vpop.permute.xlu2 %352 }
 0x427   :  { %v1710_v45 = vadd.f32 %v353_v43, %v345_v42 }
 0x429   :  { %1453 = vtanh.f32 %v1710_v45 }
 0x42f   :  { %v1454_v49 = vpop.eup %1453 }
 0x430   :  { %358 = vrot.lane.b32.xlu1 %v1454_v49, %s1562_s7 }
 0x454   :  { %v404_v53 = vpop.permute.xlu0 %403 }
 0x455   :  { %v1719_v54 = vadd.f32 %v404_v53, %v396_v52 }
 0x457   :  { %1455 = vtanh.f32 %v1719_v54 }
 0x45d   :  { %v1456_v55 = vpop.eup %1455 }
 0x45e   :  { %409 = vrot.lane.b32.xlu2 %v1456_v55, %s1562_s7 }
 0x4a2   :  { %v359_v56 = vpop.permute.xlu1 %358 }
 0x4a3   :  { %v361_v57 = vmul.f32 %v359_v56, %v338_v27 }
 0x4a5   :  { %v414_v58 = vpack.c.bf16 %v361_v57, %v361_v57 }
 0x4a7   :  { %416 = vrot.lane.b32.xlu0 %v414_v58, %s1563_s10 }
 0x4b8   :  { %v410_v59 = vpop.permute.xlu2 %409 }
 0x4b9   :  { %v412_v61 = vmul.f32 %v410_v59, %v393_v39 }
 0x4bb   :  { %v413_v62 = vpack.c.bf16 %v412_v61, %v412_v61 }
 0x4bd   :  { %435 = vrot.lane.b32.xlu1 %v413_v62, %s1563_s10  ;;  %v1428_v62 = vld [vmem:[%s1936_s0 + $0x10] sm:$0xff] }
 0x4be   :  { %1334 = vmatmul.msk.bf16.gmra.mxu0 %vm67_vm1, %v1428_v62 }
 0x4ce   :  { %1335 = vmatmul.msk.bf16.gmra.mxu0 %vm67_vm1, %v1429_v63 }
 0x519   :  { %v417_v8 = vpop.permute.xlu0 %416 }
 0x51a   :  { %1382 = vmatmul.msk.bf16.vlgmr.msra.gmra.mxu2 %vm138_vm2, %v417_v8 }
 0x51b   :  { %685 = vmatpush.bf16.msra.mxu2 %v1653_v46 }
 0x51f   :  { %686 = vmatpush.bf16.msra.mxu2 %v1664_v48 }
 0x52f   :  { %v436_v9 = vpop.permute.xlu1 %435 }
 0x530   :  { %1383 = vmatmul.msk.bf16.vlgmr.msra.gmra.mxu3 %vm138_vm2, %v436_v9  ;;  %1385 = vmatmul.msk.bf16.vlgmr.msrb.gmra.mxu2 %vm138_vm2, %v436_v9 }
 0x531   :  { %704 = vmatpush.bf16.msra.mxu3 %v1658_v47  ;;  %833 = vmatpush.bf16.msrb.mxu2 %v1658_v47 }
 0x535   :  { %705 = vmatpush.bf16.msra.mxu3 %v1674_v50  ;;  %834 = vmatpush.bf16.msrb.mxu2 %v1674_v50 }
 0x59d   :  { %v430_v0 = vpop.f32.mrf.mxu2 }
 0x5a5   :  { %v432_v10 = vpop.f32.mrf.mxu2 }
 0x5b3   :  { %v449_v14 = vpop.f32.mrf.mxu3  ;;  %v500_v15 = vpop.f32.mrf.mxu2 }
 0x5b4   :  { %v450_v16 = vadd.f32 %v449_v14, %v430_v0  ;;  %v504_v17 = vadd.f32 %v500_v15, %v166_v13  ;;  %v103_v0 = vpop.f32.mrf.mxu0 }
 0x5b6   :  { %v453_v18 = vadd.f32 %v450_v16, %v1702_v60  ;;  %1457 = vtanh.f32 %v504_v17  ;;  %v1386_v27 = vmul.f32 -1.442695, %v504_v17 }
 0x5b8   :  { %1459 = vtanh.f32 %v453_v18  ;;  %v1384_v24 = vmul.f32 -1.442695, %v453_v18 }
 0x5ba   :  { %1461 = vpow2.f32 %v1384_v24 }
 0x5bb   :  { %v451_v19 = vpop.f32.mrf.mxu3  ;;  %v502_v21 = vpop.f32.mrf.mxu2 }
 0x5bc   :  { %v1458_v22 = vpop.eup %1457  ;;  %v105_v10 = vpop.f32.mrf.mxu0 }
 0x5bd   :  { %527 = vrot.lane.b32.xlu0 %v1458_v22, %s1562_s7 }
 0x5be   :  { %v1460_v23 = vpop.eup %1459 }
 0x5bf   :  { %476 = vrot.lane.b32.xlu2 %v1460_v23, %s1562_s7 }
 0x5c0   :  { %v1462_v25 = vpop.eup %1461 }
 0x5c1   :  { %v457_v26 = vadd.f32 1.0, %v1462_v25 }
 0x5c3   :  { %1463 = vrcp.f32 %v457_v26  ;;  %v469_v35 = vand.u32 2147483648, %v457_v26  ;;  %vm463_vm0 = vweird.f32 %v457_v26  ;;  %v467_v36 = vand.u32 2147483647, %v457_v26 }
 0x5c4   :  { %1465 = vpow2.f32 %v1386_v27  ;;  %v108_v15 = vpop.f32.mrf.mxu0 }
 0x5c5   :  { %v470_v38 = vor.u32 1.1754944e-38, %v469_v35  ;;  %vm468_vm4 = vcmp.eq.f32.partialorder %v467_v36, 8.507059e+37  ;;  %v109_v22 = vadd.f32 %v108_v15, %v1631_v11 }
 0x5c7   :  { %v119_v25 = vmax.f32 %v109_v22, 0.0 }
 0x5c9   :  { %v1464_v28 = vpop.eup %1463 }
 0x5ca   :  { %v459_v29 = vmul.f32 %v1464_v28, %v457_v26  ;;  %v1466_v31 = vpop.eup %1465  ;;  %vm464_vm15 = vweird.f32 %v1464_v28 }
 0x5cb   :  { %v508_v33 = vadd.f32 1.0, %v1466_v31  ;;  %vm465_vm3 = vmor %vm463_vm0, %vm464_vm15 }
 0x5cc   :  { %v460_v30 = vsub.f32 1.0, %v459_v29  ;;  %v110_v24 = vpop.f32.mrf.mxu0 }
 0x5cd   :  { %1467 = vrcp.f32 %v508_v33  ;;  %v520_v53 = vand.u32 2147483648, %v508_v33  ;;  %vm514_vm6 = vweird.f32 %v508_v33  ;;  %v518_v55 = vand.u32 2147483647, %v508_v33 }
 0x5ce   :  { %v461_v32 = vmul.f32 %v1464_v28, %v460_v30  ;;  %v111_v26 = vadd.f32 %v110_v24, %v1631_v11 }
 0x5cf   :  { %v521_v57 = vor.u32 1.1754944e-38, %v520_v53  ;;  %vm519_vm8 = vcmp.eq.f32.partialorder %v518_v55, 8.507059e+37 }
 0x5d0   :  { %v462_v34 = vadd.f32 %v1464_v28, %v461_v32  ;;  %v120_v27 = vmax.f32 %v111_v26, 0.0 }
 0x5d2   :  { %v466_v37 = vsel %vm465_vm3, %v1464_v28, %v462_v34  ;;  %v124_v28 = vpack.c.bf16 %v120_v27, %v119_v25 }
 0x5d3   :  { %v1468_v39 = vpop.eup %1467  ;;  %v471_v41 = vsel %vm468_vm4, %v470_v38, %v466_v37 }
 0x5d4   :  { %v510_v43 = vmul.f32 %v1468_v39, %v508_v33  ;;  %vm515_vm5 = vweird.f32 %v1468_v39  ;;  %v474_v4 = vmul.f32 %v471_v41, %v1710_v45  ;;  %v106_v45 = vadd.f32 %v105_v10, %v1631_v11 }
 0x5d5   :  { %vm516_vm7 = vmor %vm514_vm6, %vm515_vm5 }
 0x5d6   :  { %v511_v49 = vsub.f32 1.0, %v510_v43  ;;  %v118_v13 = vmax.f32 %v106_v45, 0.0 }
 0x5d8   :  { %v512_v51 = vmul.f32 %v1468_v39, %v511_v49 }
 0x5da   :  { %v513_v52 = vadd.f32 %v1468_v39, %v512_v51 }
 0x5dc   :  { %v517_v56 = vsel %vm516_vm7, %v1468_v39, %v513_v52 }
 0x5dd   :  { %v522_v59 = vsel %vm519_vm8, %v521_v57, %v517_v56 }
 0x5de   :  { %v525_v44 = vmul.f32 %v522_v59, %v1719_v54  ;;  %v104_v54 = vadd.f32 %v103_v0, %v1631_v11  ;;  %v167_v11 = vpop.f32.mrf.mxu1 }
 0x5df   :  { %v168_v37 = vadd.f32 %v167_v11, %v1637_v20 }
 0x5e0   :  { %v117_v12 = vmax.f32 %v104_v54, 0.0 }
 0x5e2   :  { %v123_v14 = vpack.c.bf16 %v118_v13, %v117_v12 }
 0x5e4   :  { %1346 = vmatmul.msk.bf16.gmra.mxu1 %vm138_vm2, %v123_v14 }
 0x5f4   :  { %1347 = vmatmul.msk.bf16.gmra.mxu1 %vm138_vm2, %v124_v28 }
 0x619   :  { %v477_v40 = vpop.permute.xlu2 %476 }
 0x61a   :  { %v479_v42 = vmul.f32 %v477_v40, %v471_v41 }
 0x61c   :  { %481 = vrot.lane.b32.xlu1 %v479_v42, %s1563_s10 }
 0x62f   :  { %v528_v58 = vpop.permute.xlu0 %527 }
 0x630   :  { %v530_v61 = vmul.f32 %v528_v58, %v522_v59 }
 0x632   :  { %532 = vrot.lane.b32.xlu2 %v530_v61, %s1563_s10 }
 0x661   :  { %v1778_v31 = vpop.f32.mrf.mxu1 }
 0x669   :  { %v1780_v32 = vpop.f32.mrf.mxu1 }
 0x671   :  { %v1782_v33 = vpop.f32.mrf.mxu1 }
 0x679   :  { %v1784_v35 = vpop.f32.mrf.mxu1 }
 0x68c   :  { %v533_v2 = vpop.permute.xlu2 %532 }
 0x68d   :  { %v1752_v3 = vadd.f32 %v533_v2, %v525_v44 }
 0x68e   :  { %v482_v6 = vpop.permute.xlu1 %481 }
 0x68f   :  { %1469 = vtanh.f32 %v1752_v3  ;;  %v1756_v7 = vadd.f32 %v482_v6, %v474_v4 }
 0x691   :  { %1471 = vtanh.f32 %v1756_v7 }
 0x695   :  { %v1470_v8 = vpop.eup %1469 }
 0x696   :  { %538 = vrot.lane.b32.xlu1 %v1470_v8, %s1562_s7 }
 0x697   :  { %v1472_v9 = vpop.eup %1471 }
 0x698   :  { %487 = vrot.lane.b32.xlu0 %v1472_v9, %s1562_s7 }
 0x708   :  { %v539_v16 = vpop.permute.xlu1 %538 }
 0x709   :  { %v541_v17 = vmul.f32 %v539_v16, %v522_v59 }
 0x70a   :  { %v488_v18 = vpop.permute.xlu0 %487 }
 0x70b   :  { %v542_v19 = vpack.c.bf16 %v541_v17, %v541_v17  ;;  %v490_v21 = vmul.f32 %v488_v18, %v471_v41 }
 0x70d   :  { %v543_v23 = vpack.c.bf16 %v490_v21, %v490_v21  ;;  %564 = vrot.lane.b32.xlu0 %v542_v19, %s1563_s10 }
 0x70f   :  { %545 = vrot.lane.b32.xlu2 %v543_v23, %s1563_s10 }
 0x769   :  { %v546_v29 = vpop.permute.xlu2 %545 }
 0x76a   :  { %1387 = vmatmul.msk.bf16.vlgmr.msrb.gmra.mxu3 %vm138_vm2, %v546_v29 }
 0x76b   :  { %884 = vmatpush.bf16.msrb.mxu3 %v1603_v1 }
 0x76f   :  { %885 = vmatpush.bf16.msrb.mxu3 %v1615_v5 }
 0x77f   :  { %v565_v30 = vpop.permute.xlu0 %564 }
 0x780   :  { %1388 = vmatmul.msk.bf16.vlgmr.msrb.gmra.mxu0 %vm138_vm2, %v565_v30  ;;  %1390 = vmatmul.msk.bf16.vlgmr.msrb.gmra.mxu1 %vm138_vm2, %v565_v30 }
 0x781   :  { %943 = vmatpush.bf16.msrb.mxu0 %v1653_v46  ;;  %962 = vmatpush.bf16.msrb.mxu1 %v1658_v47 }
 0x785   :  { %963 = vmatpush.bf16.msrb.mxu1 %v1674_v50  ;;  %944 = vmatpush.bf16.msrb.mxu0 %v1664_v48 }
 0x7ed   :  { %v559_v34 = vpop.f32.mrf.mxu3 }
 0x7f5   :  { %v561_v36 = vpop.f32.mrf.mxu3 }
 0x7fd   :  { %v578_v38 = vpop.f32.mrf.mxu0  ;;  %v629_v39 = vpop.f32.mrf.mxu1 }
 0x7fe   :  { %v579_v40 = vadd.f32 %v578_v38, %v559_v34  ;;  %v633_v41 = vadd.f32 %v629_v39, %v168_v37 }
 0x800   :  { %v582_v42 = vadd.f32 %v579_v40, %v1702_v60  ;;  %1473 = vtanh.f32 %v633_v41  ;;  %v1391_v53 = vmul.f32 -1.442695, %v633_v41  ;;  %v171_v41 = vadd.f32 %v1778_v31, %v1637_v20 }
 0x802   :  { %1475 = vtanh.f32 %v582_v42  ;;  %v1389_v58 = vmul.f32 -1.442695, %v582_v42 }
 0x803   :  { %1477 = vpow2.f32 %v1391_v53 }
 0x805   :  { %v580_v43 = vpop.f32.mrf.mxu0  ;;  %v631_v49 = vpop.f32.mrf.mxu1 }
 0x806   :  { %v1474_v51 = vpop.eup %1473 }
 0x807   :  { %656 = vrot.lane.b32.xlu2 %v1474_v51, %s1562_s7 }
 0x808   :  { %v1476_v52 = vpop.eup %1475 }
 0x809   :  { %605 = vrot.lane.b32.xlu1 %v1476_v52, %s1562_s7  ;;  %v1478_v55 = vpop.eup %1477 }
 0x80a   :  { %v637_v56 = vadd.f32 1.0, %v1478_v55 }
 0x80c   :  { %1479 = vrcp.f32 %v637_v56  ;;  %v649_v4 = vand.u32 2147483648, %v637_v56  ;;  %vm643_vm9 = vweird.f32 %v637_v56  ;;  %v647_v6 = vand.u32 2147483647, %v637_v56 }
 0x80d   :  { %1481 = vpow2.f32 %v1389_v58 }
 0x80e   :  { %v650_v9 = vor.u32 1.1754944e-38, %v649_v4  ;;  %vm648_vm11 = vcmp.eq.f32.partialorder %v647_v6, 8.507059e+37 }
 0x812   :  { %v1480_v57 = vpop.eup %1479 }
 0x813   :  { %v639_v59 = vmul.f32 %v1480_v57, %v637_v56  ;;  %v1482_v63 = vpop.eup %1481  ;;  %vm644_vm1 = vweird.f32 %v1480_v57 }
 0x814   :  { %v586_v2 = vadd.f32 1.0, %v1482_v63  ;;  %vm645_vm10 = vmor %vm643_vm9, %vm644_vm1 }
 0x815   :  { %v640_v61 = vsub.f32 1.0, %v639_v59 }
 0x816   :  { %1483 = vrcp.f32 %v586_v2  ;;  %v598_v16 = vand.u32 2147483648, %v586_v2  ;;  %vm592_vm13 = vweird.f32 %v586_v2  ;;  %v596_v17 = vand.u32 2147483647, %v586_v2 }
 0x817   :  { %v641_v62 = vmul.f32 %v1480_v57, %v640_v61 }
 0x818   :  { %v599_v19 = vor.u32 1.1754944e-38, %v598_v16  ;;  %vm597_vm15 = vcmp.eq.f32.partialorder %v596_v17, 8.507059e+37 }
 0x819   :  { %v642_v44 = vadd.f32 %v1480_v57, %v641_v62 }
 0x81b   :  { %v646_v8 = vsel %vm645_vm10, %v1480_v57, %v642_v44 }
 0x81c   :  { %v651_v54 = vsel %vm648_vm11, %v650_v9, %v646_v8  ;;  %v1484_v12 = vpop.eup %1483 }
 0x81d   :  { %v588_v45 = vmul.f32 %v1484_v12, %v586_v2  ;;  %vm593_vm12 = vweird.f32 %v1484_v12  ;;  %v654_v24 = vmul.f32 %v651_v54, %v1752_v3 }
 0x81e   :  { %vm594_vm14 = vmor %vm592_vm13, %vm593_vm12 }
 0x81f   :  { %v589_v13 = vsub.f32 1.0, %v588_v45 }
 0x821   :  { %v590_v14 = vmul.f32 %v1484_v12, %v589_v13 }
 0x823   :  { %v591_v15 = vadd.f32 %v1484_v12, %v590_v14 }
 0x825   :  { %v595_v18 = vsel %vm594_vm14, %v1484_v12, %v591_v15 }
 0x826   :  { %v600_v22 = vsel %vm597_vm15, %v599_v19, %v595_v18 }
 0x827   :  { %v603_v28 = vmul.f32 %v600_v22, %v1756_v7 }
 0x861   :  { %v657_v0 = vpop.permute.xlu2 %656 }
 0x862   :  { %v659_v10 = vmul.f32 %v657_v0, %v651_v54 }
 0x864   :  { %661 = vrot.lane.b32.xlu1 %v659_v10, %s1563_s10 }
 0x87b   :  { %v606_v21 = vpop.permute.xlu1 %605 }
 0x87c   :  { %v608_v23 = vmul.f32 %v606_v21, %v600_v22 }
 0x87e   :  { %610 = vrot.lane.b32.xlu0 %v608_v23, %s1563_s10 }
 0x8d6   :  { %v662_v25 = vpop.permute.xlu1 %661 }
 0x8d7   :  { %v1793_v26 = vadd.f32 %v662_v25, %v654_v24 }
 0x8d9   :  { %1485 = vtanh.f32 %v1793_v26 }
 0x8df   :  { %v1486_v27 = vpop.eup %1485 }
 0x8e0   :  { %667 = vrot.lane.b32.xlu0 %v1486_v27, %s1562_s7 }
 0x8f0   :  { %v611_v29 = vpop.permute.xlu0 %610 }
 0x8f1   :  { %v1798_v30 = vadd.f32 %v611_v29, %v603_v28 }
 0x8f3   :  { %1487 = vtanh.f32 %v1798_v30 }
 0x8f9   :  { %v1488_v11 = vpop.eup %1487 }
 0x8fa   :  { %616 = vrot.lane.b32.xlu2 %v1488_v11, %s1562_s7 }
 0x952   :  { %v668_v34 = vpop.permute.xlu0 %667 }
 0x953   :  { %v670_v3 = vmul.f32 %v668_v34, %v651_v54 }
 0x954   :  { %v617_v36 = vpop.permute.xlu2 %616 }
 0x955   :  { %v671_v37 = vpack.c.bf16 %v670_v3, %v670_v3  ;;  %v619_v38 = vmul.f32 %v617_v36, %v600_v22 }
 0x957   :  { %v672_v39 = vpack.c.bf16 %v619_v38, %v619_v38  ;;  %693 = vrot.lane.b32.xlu2 %v671_v37, %s1563_s10 }
 0x959   :  { %674 = vrot.lane.b32.xlu1 %v672_v39, %s1563_s10 }
 0x9b1   :  { %v694_v40 = vpop.permute.xlu2 %693 }
 0x9b2   :  { %1393 = vmatmul.msk.bf16.vlgmr.msra.gmra.mxu3 %vm138_vm2, %v694_v40  ;;  %1395 = vmatmul.msk.bf16.vlgmr.msra.gmra.mxu0 %vm138_vm2, %v694_v40 }
 0x9b3   :  { %1091 = vmatpush.bf16.msra.mxu0 %v1658_v47  ;;  %1072 = vmatpush.bf16.msra.mxu3 %v1653_v46 }
 0x9b7   :  { %1092 = vmatpush.bf16.msra.mxu0 %v1674_v50  ;;  %1073 = vmatpush.bf16.msra.mxu3 %v1664_v48 }
 0x9cb   :  { %v675_v7 = vpop.permute.xlu1 %674 }
 0x9cc   :  { %1392 = vmatmul.msk.bf16.vlgmr.msra.gmra.mxu2 %vm138_vm2, %v675_v7 }
 0x9cd   :  { %1013 = vmatpush.bf16.msra.mxu2 %v1603_v1 }
 0x9d1   :  { %1014 = vmatpush.bf16.msra.mxu2 %v1615_v5 }
 0xa2f   :  { %v758_v42 = vpop.f32.mrf.mxu0 }
 0xa30   :  { %v762_v43 = vadd.f32 %v758_v42, %v171_v41 }
 0xa32   :  { %1489 = vtanh.f32 %v762_v43  ;;  %v1396_v61 = vmul.f32 -1.442695, %v762_v43 }
 0xa35   :  { %v707_v49 = vpop.f32.mrf.mxu3 }
 0xa37   :  { %v760_v51 = vpop.f32.mrf.mxu0 }
 0xa38   :  { %v1490_v52 = vpop.eup %1489 }
 0xa39   :  { %785 = vrot.lane.b32.xlu0 %v1490_v52, %s1562_s7  ;;  %v173_v52 = vadd.f32 %v1780_v32, %v1637_v20 }
 0xa3d   :  { %v709_v53 = vpop.f32.mrf.mxu3 }
 0xa4f   :  { %v688_v55 = vpop.f32.mrf.mxu2 }
 0xa50   :  { %v708_v56 = vadd.f32 %v707_v49, %v688_v55 }
 0xa52   :  { %v711_v57 = vadd.f32 %v708_v56, %v1702_v60 }
 0xa54   :  { %1491 = vtanh.f32 %v711_v57  ;;  %v1394_v4 = vmul.f32 -1.442695, %v711_v57 }
 0xa55   :  { %1493 = vpow2.f32 %v1396_v61 }
 0xa57   :  { %v690_v58 = vpop.f32.mrf.mxu2 }
 0xa5a   :  { %v1492_v59 = vpop.eup %1491 }
 0xa5b   :  { %734 = vrot.lane.b32.xlu1 %v1492_v59, %s1562_s7  ;;  %v1494_v31 = vpop.eup %1493 }
 0xa5c   :  { %v766_v62 = vadd.f32 1.0, %v1494_v31 }
 0xa5e   :  { %1495 = vrcp.f32 %v766_v62  ;;  %v778_v9 = vand.u32 2147483648, %v766_v62  ;;  %vm772_vm3 = vweird.f32 %v766_v62  ;;  %v776_v0 = vand.u32 2147483647, %v766_v62 }
 0xa5f   :  { %1497 = vpow2.f32 %v1394_v4 }
 0xa60   :  { %v779_v10 = vor.u32 1.1754944e-38, %v778_v9  ;;  %vm777_vm5 = vcmp.eq.f32.partialorder %v776_v0, 8.507059e+37 }
 0xa64   :  { %v1496_v63 = vpop.eup %1495 }
 0xa65   :  { %v768_v44 = vmul.f32 %v1496_v63, %v766_v62  ;;  %vm773_vm0 = vweird.f32 %v1496_v63  ;;  %v1498_v12 = vpop.eup %1497 }
 0xa66   :  { %vm774_vm4 = vmor %vm772_vm3, %vm773_vm0  ;;  %v715_v15 = vadd.f32 1.0, %v1498_v12 }
 0xa67   :  { %v769_v2 = vsub.f32 1.0, %v768_v44 }
 0xa68   :  { %1499 = vrcp.f32 %v715_v15  ;;  %v727_v22 = vand.u32 2147483648, %v715_v15  ;;  %vm721_vm7 = vweird.f32 %v715_v15  ;;  %v725_v23 = vand.u32 2147483647, %v715_v15 }
 0xa69   :  { %v770_v6 = vmul.f32 %v1496_v63, %v769_v2 }
 0xa6a   :  { %v728_v25 = vor.u32 1.1754944e-38, %v727_v22  ;;  %vm726_vm1 = vcmp.eq.f32.partialorder %v725_v23, 8.507059e+37 }
 0xa6b   :  { %v771_v8 = vadd.f32 %v1496_v63, %v770_v6 }
 0xa6d   :  { %v775_v54 = vsel %vm774_vm4, %v1496_v63, %v771_v8 }
 0xa6e   :  { %v780_v13 = vsel %vm777_vm5, %v779_v10, %v775_v54  ;;  %v1500_v16 = vpop.eup %1499 }
 0xa6f   :  { %v717_v17 = vmul.f32 %v1500_v16, %v715_v15  ;;  %vm722_vm6 = vweird.f32 %v1500_v16  ;;  %v783_v11 = vmul.f32 %v780_v13, %v1793_v26 }
 0xa70   :  { %vm723_vm8 = vmor %vm721_vm7, %vm722_vm6 }
 0xa71   :  { %v718_v18 = vsub.f32 1.0, %v717_v17 }
 0xa73   :  { %v719_v19 = vmul.f32 %v1500_v16, %v718_v18 }
 0xa75   :  { %v720_v21 = vadd.f32 %v1500_v16, %v719_v19 }
 0xa77   :  { %v724_v24 = vsel %vm723_vm8, %v1500_v16, %v720_v21 }
 0xa78   :  { %v729_v28 = vsel %vm726_vm1, %v728_v25, %v724_v24 }
 0xa79   :  { %v732_v37 = vmul.f32 %v729_v28, %v1798_v30 }
 0xaab   :  { %v786_v45 = vpop.permute.xlu0 %785 }
 0xaac   :  { %v788_v14 = vmul.f32 %v786_v45, %v780_v13 }
 0xaae   :  { %790 = vrot.lane.b32.xlu2 %v788_v14, %s1563_s10 }
 0xacd   :  { %v735_v27 = vpop.permute.xlu1 %734 }
 0xace   :  { %v737_v29 = vmul.f32 %v735_v27, %v729_v28 }
 0xad0   :  { %739 = vrot.lane.b32.xlu0 %v737_v29, %s1563_s10 }
 0xb08   :  { %v791_v34 = vpop.permute.xlu2 %790 }
 0xb09   :  { %v1821_v3 = vadd.f32 %v791_v34, %v783_v11 }
 0xb0b   :  { %1501 = vtanh.f32 %v1821_v3 }
 0xb11   :  { %v1502_v36 = vpop.eup %1501 }
 0xb12   :  { %796 = vrot.lane.b32.xlu1 %v1502_v36, %s1562_s7 }
 0xb42   :  { %v740_v38 = vpop.permute.xlu0 %739 }
 0xb43   :  { %v1826_v39 = vadd.f32 %v740_v38, %v732_v37 }
 0xb45   :  { %1503 = vtanh.f32 %v1826_v39 }
 0xb4b   :  { %v1504_v40 = vpop.eup %1503 }
 0xb4c   :  { %745 = vrot.lane.b32.xlu2 %v1504_v40, %s1562_s7 }
 0xb84   :  { %v797_v7 = vpop.permute.xlu1 %796 }
 0xb85   :  { %v799_v26 = vmul.f32 %v797_v7, %v780_v13 }
 0xb87   :  { %v800_v41 = vpack.c.bf16 %v799_v26, %v799_v26 }
 0xb89   :  { %822 = vrot.lane.b32.xlu0 %v800_v41, %s1563_s10 }
 0xba6   :  { %v746_v42 = vpop.permute.xlu2 %745 }
 0xba7   :  { %v748_v43 = vmul.f32 %v746_v42, %v729_v28 }
 0xba9   :  { %v801_v49 = vpack.c.bf16 %v748_v43, %v748_v43 }
 0xbab   :  { %803 = vrot.lane.b32.xlu1 %v801_v49, %s1563_s10 }
 0xbfb   :  { %v823_v51 = vpop.permute.xlu0 %822 }
 0xbfc   :  { %1398 = vmatmul.msk.bf16.vlgmr.msrb.gmra.mxu2 %vm138_vm2, %v823_v51  ;;  %1400 = vmatmul.msk.bf16.vlgmr.msrb.gmra.mxu3 %vm138_vm2, %v823_v51 }
 0xbfd   :  { %1220 = vmatpush.bf16.msrb.mxu3 %v1658_v47  ;;  %1201 = vmatpush.bf16.msrb.mxu2 %v1653_v46 }
 0xc01   :  { %1221 = vmatpush.bf16.msrb.mxu3 %v1674_v50  ;;  %1202 = vmatpush.bf16.msrb.mxu2 %v1664_v48 }
 0xc1d   :  { %v804_v30 = vpop.permute.xlu1 %803 }
 0xc1e   :  { %1397 = vmatmul.msk.bf16.vlgmr.msra.gmra.mxu1 %vm138_vm2, %v804_v30  ;;  %v176_v30 = vadd.f32 %v1782_v33, %v1637_v20 }
 0xc1f   :  { %1142 = vmatpush.bf16.msra.mxu1 %v1603_v1 }
 0xc23   :  { %1143 = vmatpush.bf16.msra.mxu1 %v1615_v5 }
 0xc7f   :  { %v836_v53 = vpop.f32.mrf.mxu2  ;;  %v887_v55 = vpop.f32.mrf.mxu3 }
 0xc80   :  { %v891_v56 = vadd.f32 %v887_v55, %v173_v52 }
 0xc82   :  { %1505 = vtanh.f32 %v891_v56  ;;  %v1401_v5 = vmul.f32 -1.442695, %v891_v56 }
 0xc87   :  { %v838_v47 = vpop.f32.mrf.mxu2  ;;  %v889_v46 = vpop.f32.mrf.mxu3 }
 0xc88   :  { %v1506_v57 = vpop.eup %1505 }
 0xc89   :  { %914 = vrot.lane.b32.xlu0 %v1506_v57, %s1562_s7 }
 0xc9b   :  { %v817_v48 = vpop.f32.mrf.mxu1 }
 0xc9c   :  { %v837_v50 = vadd.f32 %v836_v53, %v817_v48 }
 0xc9e   :  { %v840_v58 = vadd.f32 %v837_v50, %v1702_v60 }
 0xca0   :  { %1507 = vtanh.f32 %v840_v58  ;;  %v1399_v32 = vmul.f32 -1.442695, %v840_v58 }
 0xca1   :  { %1509 = vpow2.f32 %v1401_v5 }
 0xca2   :  { %1511 = vpow2.f32 %v1399_v32 }
 0xca3   :  { %v819_v1 = vpop.f32.mrf.mxu1 }
 0xca6   :  { %v1508_v59 = vpop.eup %1507 }
 0xca7   :  { %863 = vrot.lane.b32.xlu2 %v1508_v59, %s1562_s7  ;;  %v1510_v61 = vpop.eup %1509 }
 0xca8   :  { %v895_v31 = vadd.f32 1.0, %v1510_v61  ;;  %v1512_v62 = vpop.eup %1511 }
 0xca9   :  { %v844_v63 = vadd.f32 1.0, %v1512_v62 }
 0xcaa   :  { %1513 = vrcp.f32 %v895_v31  ;;  %v907_v10 = vand.u32 2147483648, %v895_v31  ;;  %vm901_vm10 = vweird.f32 %v895_v31  ;;  %v905_v12 = vand.u32 2147483647, %v895_v31 }
 0xcab   :  { %1515 = vrcp.f32 %v844_v63  ;;  %v856_v18 = vand.u32 2147483648, %v844_v63  ;;  %vm850_vm14 = vweird.f32 %v844_v63  ;;  %v854_v21 = vand.u32 2147483647, %v844_v63 }
 0xcac   :  { %v908_v14 = vor.u32 1.1754944e-38, %v907_v10  ;;  %vm906_vm12 = vcmp.eq.f32.partialorder %v905_v12, 8.507059e+37 }
 0xcad   :  { %v857_v23 = vor.u32 1.1754944e-38, %v856_v18  ;;  %vm855_vm0 = vcmp.eq.f32.partialorder %v854_v21, 8.507059e+37 }
 0xcb0   :  { %v1514_v44 = vpop.eup %1513 }
 0xcb1   :  { %v897_v2 = vmul.f32 %v1514_v44, %v895_v31  ;;  %v1516_v4 = vpop.eup %1515  ;;  %vm902_vm9 = vweird.f32 %v1514_v44 }
 0xcb2   :  { %v846_v8 = vmul.f32 %v1516_v4, %v844_v63  ;;  %vm903_vm11 = vmor %vm901_vm10, %vm902_vm9  ;;  %vm851_vm13 = vweird.f32 %v1516_v4 }
 0xcb3   :  { %v898_v6 = vsub.f32 1.0, %v897_v2  ;;  %vm852_vm15 = vmor %vm850_vm14, %vm851_vm13 }
 0xcb4   :  { %v847_v0 = vsub.f32 1.0, %v846_v8 }
 0xcb5   :  { %v899_v9 = vmul.f32 %v1514_v44, %v898_v6 }
 0xcb6   :  { %v848_v45 = vmul.f32 %v1516_v4, %v847_v0 }
 0xcb7   :  { %v900_v54 = vadd.f32 %v1514_v44, %v899_v9 }
 0xcb8   :  { %v849_v15 = vadd.f32 %v1516_v4, %v848_v45 }
 0xcb9   :  { %v904_v13 = vsel %vm903_vm11, %v1514_v44, %v900_v54 }
 0xcba   :  { %v909_v17 = vsel %vm906_vm12, %v908_v14, %v904_v13  ;;  %v853_v22 = vsel %vm852_vm15, %v1516_v4, %v849_v15 }
 0xcbb   :  { %v858_v25 = vsel %vm855_vm0, %v857_v23, %v853_v22  ;;  %v912_v28 = vmul.f32 %v909_v17, %v1821_v3 }
 0xcbc   :  { %v861_v36 = vmul.f32 %v858_v25, %v1826_v39 }
 0xcfb   :  { %v915_v16 = vpop.permute.xlu0 %914 }
 0xcfc   :  { %v917_v19 = vmul.f32 %v915_v16, %v909_v17 }
 0xcfe   :  { %919 = vrot.lane.b32.xlu2 %v917_v19, %s1563_s10 }
 0xd01   :  { %v864_v24 = vpop.permute.xlu2 %863 }
 0xd02   :  { %v866_v27 = vmul.f32 %v864_v24, %v858_v25 }
 0xd04   :  { %868 = vrot.lane.b32.xlu1 %v866_v27, %s1563_s10 }
 0xd58   :  { %v920_v29 = vpop.permute.xlu2 %919 }
 0xd59   :  { %v1849_v11 = vadd.f32 %v920_v29, %v912_v28 }
 0xd5b   :  { %1517 = vtanh.f32 %v1849_v11 }
 0xd61   :  { %v1518_v34 = vpop.eup %1517 }
 0xd62   :  { %925 = vrot.lane.b32.xlu1 %v1518_v34, %s1562_s7 }
 0xd76   :  { %v869_v37 = vpop.permute.xlu1 %868 }
 0xd77   :  { %v1854_v38 = vadd.f32 %v869_v37, %v861_v36 }
 0xd79   :  { %1519 = vtanh.f32 %v1854_v38 }
 0xd7f   :  { %v1520_v40 = vpop.eup %1519 }
 0xd80   :  { %874 = vrot.lane.b32.xlu0 %v1520_v40, %s1562_s7 }
 0xdd4   :  { %v926_v7 = vpop.permute.xlu1 %925 }
 0xdd5   :  { %v928_v3 = vmul.f32 %v926_v7, %v909_v17 }
 0xdd7   :  { %v929_v26 = vpack.c.bf16 %v928_v3, %v928_v3 }
 0xdd9   :  { %951 = vrot.lane.b32.xlu0 %v929_v26, %s1563_s10 }
 0xdf2   :  { %v875_v41 = vpop.permute.xlu0 %874 }
 0xdf3   :  { %v877_v42 = vmul.f32 %v875_v41, %v858_v25 }
 0xdf5   :  { %v930_v43 = vpack.c.bf16 %v877_v42, %v877_v42 }
 0xdf7   :  { %932 = vrot.lane.b32.xlu2 %v930_v43, %s1563_s10  ;;  %v178_v43 = vadd.f32 %v1784_v35, %v1637_v20 }
 0xe4b   :  { %v952_v49 = vpop.permute.xlu0 %951 }
 0xe4c   :  { %1403 = vmatmul.msk.bf16.vlgmr.msrb.gmra.mxu1 %vm138_vm2, %v952_v49  ;;  %1405 = vmatmul.msk.bf16.vlgmr.msra.gmra.mxu2 %vm138_vm2, %v952_v49 }
 0xe51   :  { %v933_v39 = vpop.permute.xlu2 %932 }
 0xe52   :  { %1402 = vmatmul.msk.bf16.vlgmr.msrb.gmra.mxu0 %vm138_vm2, %v933_v39 }
 0xec9   :  { %v965_v51 = vpop.f32.mrf.mxu1 }
 0xecf   :  { %v946_v52 = vpop.f32.mrf.mxu0  ;;  %v1016_v53 = vpop.f32.mrf.mxu2 }
 0xed0   :  { %v966_v55 = vadd.f32 %v965_v51, %v946_v52  ;;  %v1020_v56 = vadd.f32 %v1016_v53, %v176_v30 }
 0xed1   :  { %v967_v47 = vpop.f32.mrf.mxu1 }
 0xed2   :  { %v969_v46 = vadd.f32 %v966_v55, %v1702_v60  ;;  %1521 = vtanh.f32 %v1020_v56  ;;  %v1406_v1 = vmul.f32 -1.442695, %v1020_v56 }
 0xed4   :  { %1523 = vtanh.f32 %v969_v46  ;;  %v1404_v32 = vmul.f32 -1.442695, %v969_v46 }
 0xed5   :  { %1525 = vpow2.f32 %v1406_v1 }
 0xed7   :  { %v948_v57 = vpop.f32.mrf.mxu0  ;;  %v1018_v48 = vpop.f32.mrf.mxu2 }
 0xed8   :  { %v1522_v50 = vpop.eup %1521 }
 0xed9   :  { %1043 = vrot.lane.b32.xlu2 %v1522_v50, %s1562_s7 }
 0xeda   :  { %v1524_v58 = vpop.eup %1523 }
 0xedb   :  { %992 = vrot.lane.b32.xlu1 %v1524_v58, %s1562_s7  ;;  %v1526_v33 = vpop.eup %1525 }
 0xedc   :  { %v1024_v59 = vadd.f32 1.0, %v1526_v33 }
 0xede   :  { %1527 = vrcp.f32 %v1024_v59  ;;  %v1036_v4 = vand.u32 2147483648, %v1024_v59  ;;  %vm1030_vm4 = vweird.f32 %v1024_v59  ;;  %v1034_v6 = vand.u32 2147483647, %v1024_v59 }
 0xedf   :  { %1529 = vpow2.f32 %v1404_v32 }
 0xee0   :  { %v1037_v9 = vor.u32 1.1754944e-38, %v1036_v4  ;;  %vm1035_vm6 = vcmp.eq.f32.partialorder %v1034_v6, 8.507059e+37 }
 0xee4   :  { %v1528_v5 = vpop.eup %1527 }
 0xee5   :  { %v1026_v61 = vmul.f32 %v1528_v5, %v1024_v59  ;;  %v1530_v63 = vpop.eup %1529  ;;  %vm1031_vm3 = vweird.f32 %v1528_v5 }
 0xee6   :  { %v973_v2 = vadd.f32 1.0, %v1530_v63  ;;  %vm1032_vm5 = vmor %vm1030_vm4, %vm1031_vm3 }
 0xee7   :  { %v1027_v31 = vsub.f32 1.0, %v1026_v61 }
 0xee8   :  { %1531 = vrcp.f32 %v973_v2  ;;  %v985_v16 = vand.u32 2147483648, %v973_v2  ;;  %vm979_vm8 = vweird.f32 %v973_v2  ;;  %v983_v17 = vand.u32 2147483647, %v973_v2 }
 0xee9   :  { %v1028_v62 = vmul.f32 %v1528_v5, %v1027_v31 }
 0xeea   :  { %v986_v19 = vor.u32 1.1754944e-38, %v985_v16  ;;  %vm984_vm9 = vcmp.eq.f32.partialorder %v983_v17, 8.507059e+37 }
 0xeeb   :  { %v1029_v44 = vadd.f32 %v1528_v5, %v1028_v62 }
 0xeed   :  { %v1033_v8 = vsel %vm1032_vm5, %v1528_v5, %v1029_v44 }
 0xeee   :  { %v1038_v54 = vsel %vm1035_vm6, %v1037_v9, %v1033_v8  ;;  %v1532_v12 = vpop.eup %1531 }
 0xeef   :  { %v975_v45 = vmul.f32 %v1532_v12, %v973_v2  ;;  %vm980_vm7 = vweird.f32 %v1532_v12  ;;  %v1041_v24 = vmul.f32 %v1038_v54, %v1849_v11 }
 0xef0   :  { %vm981_vm1 = vmor %vm979_vm8, %vm980_vm7  ;;  %vm1283_vm8 = vcmask 7168  }
 0xef1   :  { %v976_v13 = vsub.f32 1.0, %v975_v45 }
 0xef3   :  { %v977_v14 = vmul.f32 %v1532_v12, %v976_v13 }
 0xef5   :  { %v978_v15 = vadd.f32 %v1532_v12, %v977_v14 }
 0xef7   :  { %v982_v18 = vsel %vm981_vm1, %v1532_v12, %v978_v15 }
 0xef8   :  { %v987_v22 = vsel %vm984_vm9, %v986_v19, %v982_v18 }
 0xef9   :  { %v990_v29 = vmul.f32 %v987_v22, %v1854_v38 }
 0xf33   :  { %v1044_v0 = vpop.permute.xlu2 %1043 }
 0xf34   :  { %v1046_v10 = vmul.f32 %v1044_v0, %v1038_v54 }
 0xf36   :  { %1048 = vrot.lane.b32.xlu1 %v1046_v10, %s1563_s10 }
 0xf4d   :  { %v993_v21 = vpop.permute.xlu1 %992 }
 0xf4e   :  { %v995_v23 = vmul.f32 %v993_v21, %v987_v22 }
 0xf50   :  { %997 = vrot.lane.b32.xlu0 %v995_v23, %s1563_s10 }
 0xfa8   :  { %v1049_v25 = vpop.permute.xlu1 %1048 }
 0xfa9   :  { %v1871_v27 = vadd.f32 %v1049_v25, %v1041_v24 }
 0xfab   :  { %1533 = vtanh.f32 %v1871_v27 }
 0xfb1   :  { %v1534_v28 = vpop.eup %1533 }
 0xfb2   :  { %1054 = vrot.lane.b32.xlu0 %v1534_v28, %s1562_s7 }
 0xfc2   :  { %v998_v34 = vpop.permute.xlu0 %997 }
 0xfc3   :  { %v1876_v36 = vadd.f32 %v998_v34, %v990_v29 }
 0xfc5   :  { %1535 = vtanh.f32 %v1876_v36 }
 0xfcb   :  { %v1536_v37 = vpop.eup %1535 }
 0xfcc   :  { %1003 = vrot.lane.b32.xlu2 %v1536_v37, %s1562_s7 }
0x1024   :  { %v1055_v40 = vpop.permute.xlu0 %1054 }
0x1025   :  { %v1057_v11 = vmul.f32 %v1055_v40, %v1038_v54 }
0x1026   :  { %v1004_v7 = vpop.permute.xlu2 %1003 }
0x1027   :  { %v1058_v3 = vpack.c.bf16 %v1057_v11, %v1057_v11  ;;  %v1006_v26 = vmul.f32 %v1004_v7, %v987_v22 }
0x1029   :  { %v1059_v41 = vpack.c.bf16 %v1006_v26, %v1006_v26  ;;  %1080 = vrot.lane.b32.xlu2 %v1058_v3, %s1563_s10 }
0x102b   :  { %1061 = vrot.lane.b32.xlu1 %v1059_v41, %s1563_s10 }
0x1083   :  { %v1081_v42 = vpop.permute.xlu2 %1080 }
0x1084   :  { %1408 = vmatmul.msk.bf16.vlgmr.msra.gmra.mxu0 %vm138_vm2, %v1081_v42  ;;  %1410 = vmatmul.msk.bf16.vlgmr.msra.gmra.mxu1 %vm138_vm2, %v1081_v42 }
0x109d   :  { %v1062_v38 = vpop.permute.xlu1 %1061 }
0x109e   :  { %1407 = vmatmul.msk.bf16.vlgmr.msra.gmra.mxu3 %vm138_vm2, %v1062_v38 }
0x1101   :  { %v1094_v49 = vpop.f32.mrf.mxu0  ;;  %v1145_v39 = vpop.f32.mrf.mxu1 }
0x1102   :  { %v1149_v51 = vadd.f32 %v1145_v39, %v178_v43 }
0x1104   :  { %1537 = vtanh.f32 %v1149_v51  ;;  %v1411_v48 = vmul.f32 -1.442695, %v1149_v51 }
0x1109   :  { %v1096_v30 = vpop.f32.mrf.mxu0  ;;  %v1147_v52 = vpop.f32.mrf.mxu1 }
0x110a   :  { %v1538_v53 = vpop.eup %1537 }
0x110b   :  { %1172 = vrot.lane.b32.xlu1 %v1538_v53, %s1562_s7 }
0x1121   :  { %v1075_v55 = vpop.f32.mrf.mxu3 }
0x1122   :  { %v1095_v56 = vadd.f32 %v1094_v49, %v1075_v55 }
0x1124   :  { %v1098_v47 = vadd.f32 %v1095_v56, %v1702_v60 }
0x1126   :  { %1539 = vtanh.f32 %v1098_v47  ;;  %v1409_v33 = vmul.f32 -1.442695, %v1098_v47 }
0x1127   :  { %1541 = vpow2.f32 %v1411_v48 }
0x1129   :  { %v1077_v46 = vpop.f32.mrf.mxu3 }
0x112c   :  { %v1540_v57 = vpop.eup %1539 }
0x112d   :  { %1121 = vrot.lane.b32.xlu0 %v1540_v57, %s1562_s7  ;;  %v1542_v20 = vpop.eup %1541 }
0x112e   :  { %v1153_v35 = vadd.f32 1.0, %v1542_v20 }
0x1130   :  { %1543 = vrcp.f32 %v1153_v35  ;;  %v1165_v32 = vand.u32 2147483648, %v1153_v35  ;;  %vm1159_vm11 = vweird.f32 %v1153_v35  ;;  %v1163_v61 = vand.u32 2147483647, %v1153_v35 }
0x1131   :  { %1545 = vpow2.f32 %v1409_v33 }
0x1132   :  { %v1166_v62 = vor.u32 1.1754944e-38, %v1165_v32  ;;  %vm1164_vm13 = vcmp.eq.f32.partialorder %v1163_v61, 8.507059e+37 }
0x1136   :  { %v1544_v50 = vpop.eup %1543 }
0x1137   :  { %v1155_v58 = vmul.f32 %v1544_v50, %v1153_v35  ;;  %vm1160_vm10 = vweird.f32 %v1544_v50  ;;  %v1546_v63 = vpop.eup %1545 }
0x1138   :  { %vm1161_vm12 = vmor %vm1159_vm11, %vm1160_vm10  ;;  %v1102_v6 = vadd.f32 1.0, %v1546_v63 }
0x1139   :  { %v1156_v1 = vsub.f32 1.0, %v1155_v58  ;;  %v1561_v58 = vld [vmem:[%s1934_s3] sm:$0xff] }
0x113a   :  { %1547 = vrcp.f32 %v1102_v6  ;;  %v1114_v12 = vand.u32 2147483648, %v1102_v6  ;;  %vm1108_vm15 = vweird.f32 %v1102_v6  ;;  %v1112_v45 = vand.u32 2147483647, %v1102_v6 }
0x113b   :  { %v1157_v59 = vmul.f32 %v1544_v50, %v1156_v1  ;;  %v1265_v1 = vperm.slane %v1561_v58, 7 }
0x113c   :  { %v1115_v14 = vor.u32 1.1754944e-38, %v1114_v12  ;;  %vm1113_vm3 = vcmp.eq.f32.partialorder %v1112_v45, 8.507059e+37 }
0x113d   :  { %v1158_v5 = vadd.f32 %v1544_v50, %v1157_v59 }
0x113f   :  { %v1162_v31 = vsel %vm1161_vm12, %v1544_v50, %v1158_v5 }
0x1140   :  { %v1167_v2 = vsel %vm1164_vm13, %v1166_v62, %v1162_v31  ;;  %v1548_v8 = vpop.eup %1547 }
0x1141   :  { %v1104_v9 = vmul.f32 %v1548_v8, %v1102_v6  ;;  %vm1109_vm14 = vweird.f32 %v1548_v8  ;;  %v1170_v18 = vmul.f32 %v1167_v2, %v1871_v27 }
0x1142   :  { %vm1110_vm0 = vmor %vm1108_vm15, %vm1109_vm14 }
0x1143   :  { %v1105_v0 = vsub.f32 1.0, %v1104_v9 }
0x1145   :  { %v1106_v54 = vmul.f32 %v1548_v8, %v1105_v0 }
0x1147   :  { %v1107_v10 = vadd.f32 %v1548_v8, %v1106_v54 }
0x1149   :  { %v1111_v13 = vsel %vm1110_vm0, %v1548_v8, %v1107_v10 }
0x114a   :  { %v1116_v16 = vsel %vm1113_vm3, %v1115_v14, %v1111_v13 }
0x114b   :  { %v1119_v23 = vmul.f32 %v1116_v16, %v1876_v36 }
0x117d   :  { %v1173_v44 = vpop.permute.xlu1 %1172 }
0x117e   :  { %v1175_v4 = vmul.f32 %v1173_v44, %v1167_v2 }
0x1180   :  { %1177 = vrot.lane.b32.xlu0 %v1175_v4, %s1563_s10 }
0x119f   :  { %v1122_v15 = vpop.permute.xlu0 %1121 }
0x11a0   :  { %v1124_v17 = vmul.f32 %v1122_v15, %v1116_v16 }
0x11a2   :  { %1126 = vrot.lane.b32.xlu2 %v1124_v17, %s1563_s10 }
0x11f2   :  { %v1178_v19 = vpop.permute.xlu0 %1177 }
0x11f3   :  { %v1893_v21 = vadd.f32 %v1178_v19, %v1170_v18 }
0x11f5   :  { %1549 = vtanh.f32 %v1893_v21 }
0x11fb   :  { %v1550_v22 = vpop.eup %1549 }
0x11fc   :  { %1183 = vrot.lane.b32.xlu2 %v1550_v22, %s1562_s7  ;;  %v1127_v24 = vpop.permute.xlu2 %1126 }
0x11fd   :  { %v1129_v25 = vadd.f32 %v1127_v24, %v1119_v23 }
0x11ff   :  { %1551 = vtanh.f32 %v1129_v25 }
0x1205   :  { %v1552_v28 = vpop.eup %1551 }
0x1206   :  { %1132 = vrot.lane.b32.xlu1 %v1552_v28, %s1562_s7 }
0x1256   :  { %v1184_v29 = vpop.permute.xlu2 %1183 }
0x1257   :  { %v1186_v34 = vmul.f32 %v1184_v29, %v1167_v2 }
0x1259   :  { %v1187_v37 = vpack.c.bf16 %v1186_v34, %v1186_v34 }
0x125b   :  { %1209 = vrot.lane.b32.xlu1 %v1187_v37, %s1563_s10 }
0x1278   :  { %v1133_v27 = vpop.permute.xlu1 %1132 }
0x1279   :  { %v1135_v40 = vmul.f32 %v1133_v27, %v1116_v16 }
0x127b   :  { %v1188_v11 = vpack.c.bf16 %v1135_v40, %v1135_v40 }
0x127d   :  { %1190 = vrot.lane.b32.xlu0 %v1188_v11, %s1563_s10 }
0x12cd   :  { %v1210_v7 = vpop.permute.xlu1 %1209 }
0x12ce   :  { %1413 = vmatmul.msk.bf16.vlgmr.msrb.gmra.mxu3 %vm138_vm2, %v1210_v7 }
0x12ef   :  { %v1191_v36 = vpop.permute.xlu0 %1190 }
0x12f0   :  { %1412 = vmatmul.msk.bf16.vlgmr.msrb.gmra.mxu2 %vm138_vm2, %v1191_v36 }
0x1351   :  { %v1223_v3 = vpop.f32.mrf.mxu3 }
0x1359   :  { %v1225_v26 = vpop.f32.mrf.mxu3 }
0x1373   :  { %v1204_v41 = vpop.f32.mrf.mxu2 }
0x1374   :  { %v1224_v42 = vadd.f32 %v1223_v3, %v1204_v41 }
0x1376   :  { %v1227_v38 = vadd.f32 %v1224_v42, %v1702_v60 }
0x1378   :  { %1553 = vtanh.f32 %v1227_v38  ;;  %v1414_v39 = vmul.f32 -1.442695, %v1227_v38 }
0x137a   :  { %1555 = vpow2.f32 %v1414_v39 }
0x137b   :  { %v1206_v43 = vpop.f32.mrf.mxu2 }
0x137e   :  { %v1554_v49 = vpop.eup %1553 }
0x137f   :  { %1250 = vrot.lane.b32.xlu2 %v1554_v49, %s1562_s7 }
0x1380   :  { %v1556_v51 = vpop.eup %1555 }
0x1381   :  { %v1231_v30 = vadd.f32 1.0, %v1556_v51 }
0x1383   :  { %1557 = vrcp.f32 %v1231_v30  ;;  %v1243_v46 = vand.u32 2147483648, %v1231_v30  ;;  %vm1237_vm5 = vweird.f32 %v1231_v30  ;;  %v1241_v57 = vand.u32 2147483647, %v1231_v30 }
0x1385   :  { %v1244_v48 = vor.u32 1.1754944e-38, %v1243_v46  ;;  %vm1242_vm7 = vcmp.eq.f32.partialorder %v1241_v57, 8.507059e+37 }
0x1387   :  { %1267 = vrot.lane.b32.xlu2 %v1265_v1, %s1564_s28 }
0x1389   :  { %v1558_v52 = vpop.eup %1557 }
0x138a   :  { %v1233_v53 = vmul.f32 %v1558_v52, %v1231_v30  ;;  %vm1238_vm4 = vweird.f32 %v1558_v52 }
0x138b   :  { %vm1239_vm6 = vmor %vm1237_vm5, %vm1238_vm4 }
0x138c   :  { %v1234_v55 = vsub.f32 1.0, %v1233_v53 }
0x138e   :  { %v1235_v56 = vmul.f32 %v1558_v52, %v1234_v55 }
0x1390   :  { %v1236_v47 = vadd.f32 %v1558_v52, %v1235_v56 }
0x1392   :  { %v1240_v60 = vsel %vm1239_vm6, %v1558_v52, %v1236_v47 }
0x1393   :  { %v1245_v35 = vsel %vm1242_vm7, %v1244_v48, %v1240_v60 }
0x1394   :  { %v1248_v33 = vmul.f32 %v1245_v35, %v1129_v25 }
0x13d9   :  { %v1251_v20 = vpop.permute.xlu2 %1250 }
0x13da   :  { %v1253_v50 = vmul.f32 %v1251_v20, %v1245_v35 }
0x13dc   :  { %1255 = vrot.lane.b32.xlu0 %v1253_v50, %s1563_s10 }
0x13e1   :  { %v1268_v31 = vpop.permute.xlu2 %1267 }
0x144e   :  { %v1256_v59 = vpop.permute.xlu0 %1255 }
0x144f   :  { %v1258_v5 = vadd.f32 %v1256_v59, %v1248_v33 }
0x1451   :  { %1559 = vtanh.f32 %v1258_v5 }
0x1457   :  { %v1560_v32 = vpop.eup %1559 }
0x1458   :  { %1261 = vrot.lane.b32.xlu1 %v1560_v32, %s1562_s7 }
0x14ca   :  { %v1262_v61 = vpop.permute.xlu1 %1261 }
0x14cb   :  { %v1264_v62 = vmul.f32 %v1262_v61, %v1245_v35 }
0x14cd   :  { %v1270_v63 = vmul.f32 %v1268_v31, %v1264_v62  ;;  %1291 = vrot.lane.b32.xlu2 %v1264_v62, %s1563_s10 }
0x14cf   :  { %1272 = vrot.lane.b32.xlu0 %v1270_v63, %s1563_s10 }
0x14d7   :  { %1286 = vrot.lane.b32.xlu0 %v1186_v34, %s1563_s10 }
0x14df   :  { %1297 = vrot.lane.b32.xlu0 %v1893_v21, %s1564_s28 }
0x1527   :  { %v1292_v44 = vpop.permute.xlu2 %1291 }
0x1528   :  { %1415 = vst.msk [vmem:[%s1938_s5 + $0x8] sm:$0xff] %vm138_vm2, %v1292_v44 }
0x1541   :  { %v1273_v2 = vpop.permute.xlu0 %1272 }
0x1542   :  { %v1275_v4 = vsel %vm138_vm2, %v1273_v2, 0.0 }
0x1543   :  { %1276 = vadd.xlane.f32.xlu1 %v1275_v4 }
0x1549   :  { %v1287_v6 = vpop.permute.xlu0 %1286 }
0x154a   :  { %1289 = vst.msk [vmem:[%s1938_s5] sm:$0xff] %vm138_vm2, %v1287_v6 }
0x1551   :  { %v1298_v8 = vpop.permute.xlu0 %1297 }
0x1552   :  { %1416 = vst.msk [vmem:[%s1938_s5 + $0x10] sm:$0xff] %vm138_vm2, %v1298_v8 }
0x15b6   :  { %v1277_v9 = vpop.xlane.xlu1 %1276 }
0x15b7   :  { %v1278_v0 = vadd.f32 %v1277_v9, %v1265_v1 }
0x15b9   :  { %1280 = vrot.lane.b32.xlu2 %v1278_v0, %s1564_s28 }
0x15c1   :  { %1303 = vrot.lane.b32.xlu2 %v1258_v5, %s1564_s28 }
0x1613   :  { %v1281_v54 = vpop.permute.xlu2 %1280 }
0x1614   :  { %1284 = vst.msk [vmem:[%s1939_s4] sm:$0xff] %vm1283_vm8, %v1281_v54 }
0x161b   :  { %v1304_v10 = vpop.permute.xlu2 %1303 }
0x161c   :  { %1417 = vst.msk [vmem:[%s1938_s5 + $0x18] sm:$0xff] %vm138_vm2, %v1304_v10 }

</bundles_post_ra>
